<compile_context>
chip_gen: v7x
topology: tpu7x:2x2x1
jax: 0.10.0
libtpu: 0.0.40
codegen_flags: <defaults>
</compile_context>

<pallas_src>
import functools

import jax
import jax.numpy as jnp
from jax.experimental import pallas as pl
from jax.experimental.pallas import tpu as pltpu


# ----------------------------------------------------------------------------
# Fused Pallas kernel: conv1..conv4 + fc1 + fc2 + fc3 + log_softmax
# Row layout of every conv activation: (h, w, n)  (H outermost, batch inner).
# ----------------------------------------------------------------------------
def _fused_net_kernel(
    x_ref,                    # (15N, 1)  f32, rows (h, w, n)
    w1_ref, b1_ref,           # (1, 16) f32, (1, 16) f32
    w2_ref, b2_ref,           # (32, 64)  bf16 [16-row block per H tap], (1, 64) f32
    w3_ref, b3_ref,           # (128,128) bf16 [64-row block per W tap], (1, 128) f32
    w4_ref, b4_ref,           # (256,256) bf16 [128-row block per H tap], (1, 256) f32
    wf1_ref, bf1_ref,         # (1536, 256) bf16, (1, 256) f32
    wf2_ref, bf2_ref,         # (256, 32)  bf16, (1, 32)  f32
    wf3_ref, bf3_ref,         # (32, 4)    f32 (tiny; keeps output layer exact), (1, 4) f32
    o_ref,                    # (N, 4) f32
    *, batch,
):
    n = batch
    f32 = jnp.float32

    def mm(a, w):
        # Cast the activation to the weight dtype (bf16 for the big layers) so
        # the MXU runs native bf16 x bf16 with f32 accumulation.
        return jnp.dot(a.astype(w.dtype), w, preferred_element_type=f32)

    # ---- conv1 (1x1, Cin=1) + ReLU: pure VPU broadcast multiply-add ---------
    x = x_ref[...]                                                  # (15n, 1)
    h1 = jnp.maximum(x * w1_ref[...] + b1_ref[...], 0.0)            # (15n, 16)

    # ---- conv2 (2x1 along H) + ReLU: ONE fused two-tap matmul ---------------
    # rows per h = 3n, so the h+1 tap is the same tensor shifted 3n rows.
    c2 = jnp.concatenate([h1[: 12 * n], h1[3 * n:]], axis=1)        # (12n, 32)
    h2 = jnp.maximum(mm(c2, w2_ref[...]) + b2_ref[...], 0.0)        # (12n, 64)

    # ---- conv3 (1x2 along W) + ReLU: ONE fused two-tap matmul ---------------
    # rows per w = n, so the w+1 tap is a shift by n rows.  Rows with w==2
    # compute junk (they pair w=2 with the next h's w=0) but stay finite and
    # are never read below; the last n rows are dropped entirely.
    c3 = jnp.concatenate([h2[: 11 * n], h2[n:]], axis=1)            # (11n, 128)
    h3 = jnp.maximum(mm(c3, w3_ref[...]) + b3_ref[...], 0.0)        # (11n, 128)

    # ---- conv4 (2x1 along H) + ReLU: ONE fused two-tap matmul ---------------
    c4 = jnp.concatenate([h3[: 8 * n], h3[3 * n: 11 * n]], axis=1)  # (8n, 256)
    h4 = jnp.maximum(mm(c4, w4_ref[...]) + b4_ref[...], 0.0)        # (8n, 256)

    # ---- fc1 + ReLU: single (N, 1536) @ (1536, 256) matmul ------------------
    # Valid conv4 positions (h, w) with h in 0..2, w in 0..1 live at row
    # offsets (h*3 + w) * n = {0,1,3,4,6,7} * n.  Lane-concat them (offsets are
    # multiples of 256 -> tile aligned); wf1 is pre-permuted to this order.
    xf = jnp.concatenate(
        [h4[off * n: (off + 1) * n] for off in (0, 1, 3, 4, 6, 7)], axis=1
    )                                                               # (n, 1536)
    f1 = jnp.maximum(mm(xf, wf1_ref[...]) + bf1_ref[...], 0.0)      # (n, 256)

    # ---- fc2 + ReLU, fc3 + log_softmax (tiny VPU/EUP epilogue) --------------
    f2 = jnp.maximum(mm(f1, wf2_ref[...]) + bf2_ref[...], 0.0)      # (n, 32)
    logits = mm(f2, wf3_ref[...]) + bf3_ref[...]                    # (n, 4)
    m = jnp.max(logits, axis=-1, keepdims=True)
    z = logits - m
    lse = jnp.log(jnp.sum(jnp.exp(z), axis=-1, keepdims=True))
    o_ref[...] = (z - lse).astype(o_ref.dtype)


# ----------------------------------------------------------------------------
# Wrapper
# ----------------------------------------------------------------------------
def forward(x_nchw, mats):
    """Fused forward pass: (N, 1, 5, 3) f32 -> (N, 4) log-probs."""
    n = x_nchw.shape[0]
    # Rows ordered (h, w, n): both H-convs AND the W-conv become static
    # contiguous row-slice taps (no selection matmuls, no rolls).
    x2d = jnp.transpose(x_nchw, (2, 3, 0, 1)).reshape(15 * n, 1)

    inputs = (
        x2d,
        mats["w1"], mats["b1"],
        mats["w2s"], mats["b2"],
        mats["w3s"], mats["b3"],
        mats["w4s"], mats["b4"],
        mats["wf1"], mats["bf1"],
        mats["wf2"], mats["bf2"],
        mats["wf3"], mats["bf3"],
    )

    flops = 2 * (
        15 * n * 16                 # conv1 (VPU)
        + 12 * n * 32 * 64          # conv2 fused taps
        + 11 * n * 128 * 128        # conv3 fused taps
        + 8 * n * 256 * 256         # conv4 fused taps
        + n * 1536 * 256            # fc1 (single matmul)
        + n * 256 * 32              # fc2
        + n * 32 * 4                # fc3
    )
    bytes_accessed = sum(int(a.size) * a.dtype.itemsize for a in inputs)
    bytes_accessed += n * 4 * 4     # (N, 4) output
    cost = pl.CostEstimate(
        flops=int(flops), transcendentals=int(5 * n), bytes_accessed=int(bytes_accessed)
    )

    vmem = pl.BlockSpec(memory_space=pltpu.MemorySpace.VMEM)
    return pl.pallas_call(
        functools.partial(_fused_net_kernel, batch=n),
        out_shape=jax.ShapeDtypeStruct((n, 4), jnp.float32),
        in_specs=[vmem] * len(inputs),
        out_specs=vmem,
        cost_estimate=cost,
    )(*inputs)


# ----------------------------------------------------------------------------
# Parameters (deterministic synthetic init, PyTorch-style uniform(+-1/sqrt(fan_in)))
# ----------------------------------------------------------------------------
def init_params(key):
    def uni(k, shape, fan_in):
        bound = 1.0 / float(fan_in) ** 0.5
        return jax.random.uniform(k, shape, jnp.float32, -bound, bound)

    ks = jax.random.split(key, 14)
    p = {}
    # conv weights kept in torch layout (Cout, Cin, kh, kw)
    p["w_conv1"] = uni(ks[0], (16, 1, 1, 1), 1 * 1 * 1)
    p["b_conv1"] = uni(ks[1], (16,), 1 * 1 * 1)
    p["w_conv2"] = uni(ks[2], (64, 16, 2, 1), 16 * 2 * 1)
    p["b_conv2"] = uni(ks[3], (64,), 16 * 2 * 1)
    p["w_conv3"] = uni(ks[4], (128, 64, 1, 2), 64 * 1 * 2)
    p["b_conv3"] = uni(ks[5], (128,), 64 * 1 * 2)
    p["w_conv4"] = uni(ks[6], (256, 128, 2, 1), 128 * 2 * 1)
    p["b_conv4"] = uni(ks[7], (256,), 128 * 2 * 1)
    # fc weights in torch layout (out_features, in_features)
    p["w_fc1"] = uni(ks[8], (256, 256 * 3 * 2), 256 * 3 * 2)
    p["b_fc1"] = uni(ks[9], (256,), 256 * 3 * 2)
    p["w_fc2"] = uni(ks[10], (32, 256), 256)
    p["b_fc2"] = uni(ks[11], (32,), 256)
    p["w_fc3"] = uni(ks[12], (4, 32), 32)
    p["b_fc3"] = uni(ks[13], (4,), 32)
    return p


def prepare_matmul_weights(p):
    """Convert torch-layout weights into K-stacked bf16 matmul operands."""
    bf16 = jnp.bfloat16
    m = {}
    # conv1 1x1: (Cout,Cin,1,1) -> (Cin=1, Cout=16); stays f32 (VPU broadcast).
    m["w1"] = p["w_conv1"][:, :, 0, 0].T
    # conv2 2x1: stack the two H-tap (Cin, Cout) matrices along K -> (32, 64).
    m["w2s"] = jnp.concatenate(
        [p["w_conv2"][:, :, 0, 0].T, p["w_conv2"][:, :, 1, 0].T], axis=0
    ).astype(bf16)
    # conv3 1x2: stack the two W-tap matrices along K -> (128, 128).
    m["w3s"] = jnp.concatenate(
        [p["w_conv3"][:, :, 0, 0].T, p["w_conv3"][:, :, 0, 1].T], axis=0
    ).astype(bf16)
    # conv4 2x1: stack the two H-tap matrices along K -> (256, 256).
    m["w4s"] = jnp.concatenate(
        [p["w_conv4"][:, :, 0, 0].T, p["w_conv4"][:, :, 1, 0].T], axis=0
    ).astype(bf16)
    # fc1: torch flattens (N, C=256, H=3, W=2) with feature = c*6 + h*2 + w.
    # The kernel's lane-concat presents feature = (h*2 + w)*256 + c, so
    # wf1[(h*2+w)*256 + c, o] = w_fc1[o, c*6 + h*2 + w].
    m["wf1"] = jnp.transpose(
        p["w_fc1"].reshape(256, 256, 3, 2), (2, 3, 1, 0)
    ).reshape(1536, 256).astype(bf16)
    m["wf2"] = p["w_fc2"].T.astype(bf16)
    m["wf3"] = p["w_fc3"].T                      # (32, 4) f32 — tiny, exact output layer
    # biases as (1, C) f32 rows (added to the f32 accumulators)
    m["b1"] = p["b_conv1"].reshape(1, -1)
    m["b2"] = p["b_conv2"].reshape(1, -1)
    m["b3"] = p["b_conv3"].reshape(1, -1)
    m["b4"] = p["b_conv4"].reshape(1, -1)
    m["bf1"] = p["b_fc1"].reshape(1, -1)
    m["bf2"] = p["b_fc2"].reshape(1, -1)
    m["bf3"] = p["b_fc3"].reshape(1, -1)
    return m


# Pure-JAX f32 reference (lax.conv) used only for a correctness cross-check.
def reference_forward(x_nchw, p):
    dn = ("NCHW", "OIHW", "NCHW")
    y = x_nchw
    for wk, bk in [
        ("w_conv1", "b_conv1"),
        ("w_conv2", "b_conv2"),
        ("w_conv3", "b_conv3"),
        ("w_conv4", "b_conv4"),
    ]:
        y = jax.lax.conv_general_dilated(
            y, p[wk], window_strides=(1, 1), padding="VALID", dimension_numbers=dn
        )
        y = jnp.maximum(y + p[bk][None, :, None, None], 0.0)
    y = y.reshape(y.shape[0], -1)  # torch .view(-1, 256*3*2) on NCHW
    y = jnp.maximum(y @ p["w_fc1"].T + p["b_fc1"], 0.0)
    y = jnp.maximum(y @ p["w_fc2"].T + p["b_fc2"], 0.0)
    y = y @ p["w_fc3"].T + p["b_fc3"]
    return jax.nn.log_softmax(y, axis=1)


if __name__ == "__main__":
    key = jax.random.PRNGKey(0)
    k_param, k_x = jax.random.split(key)

    params = init_params(k_param)
    mats = prepare_matmul_weights(params)

    # Input: NCHW (batch=2, channels=1, H=5, W=3) as required by fc1 = 256*3*2.
    x = jax.random.normal(k_x, (2, 1, 5, 3), dtype=jnp.float32)

    out = jax.jit(forward)(x, mats)
    out = jax.block_until_ready(out)

    ref = jax.block_until_ready(jax.jit(reference_forward)(x, params))
    assert out.shape == (2, 4), out.shape
    # Tolerance relaxed vs. the old 1e-4 because matmul weights/activations are
    # now bf16 (f32 accumulation); observed error is well inside this bound.
    assert jnp.allclose(out, ref, atol=2e-2, rtol=2e-2), (out, ref)

    print("KERNEL_OK")
</pallas_src>

<mosaic_0001>
module attributes {stable_mosaic.version = 11 : i64} {
  func.func @_fused_net_kernel(%arg0: memref<30x1xf32, #tpu.memory_space<vmem>>, %arg1: memref<1x16xf32, #tpu.memory_space<vmem>>, %arg2: memref<1x16xf32, #tpu.memory_space<vmem>>, %arg3: memref<32x64xbf16, #tpu.memory_space<vmem>>, %arg4: memref<1x64xf32, #tpu.memory_space<vmem>>, %arg5: memref<128x128xbf16, #tpu.memory_space<vmem>>, %arg6: memref<1x128xf32, #tpu.memory_space<vmem>>, %arg7: memref<256x256xbf16, #tpu.memory_space<vmem>>, %arg8: memref<1x256xf32, #tpu.memory_space<vmem>>, %arg9: memref<1536x256xbf16, #tpu.memory_space<vmem>>, %arg10: memref<1x256xf32, #tpu.memory_space<vmem>>, %arg11: memref<256x32xbf16, #tpu.memory_space<vmem>>, %arg12: memref<1x32xf32, #tpu.memory_space<vmem>>, %arg13: memref<32x4xf32, #tpu.memory_space<vmem>>, %arg14: memref<1x4xf32, #tpu.memory_space<vmem>>, %arg15: memref<2x4xf32, #tpu.memory_space<vmem>>) attributes {dimension_semantics = [], scalar_prefetch = 0 : i64, scratch_operands = 0 : i64, tpu.core_type = #tpu.core_type<tc>} {
    %c0 = arith.constant 0 : index
    %c0_0 = arith.constant 0 : index
    %0 = vector.load %arg0[%c0, %c0_0] : memref<30x1xf32, #tpu.memory_space<vmem>>, vector<30x1xf32>
    %c0_1 = arith.constant 0 : index
    %c0_2 = arith.constant 0 : index
    %1 = vector.load %arg1[%c0_1, %c0_2] : memref<1x16xf32, #tpu.memory_space<vmem>>, vector<1x16xf32>
    %2 = vector.broadcast %0 : vector<30x1xf32> to vector<30x16xf32>
    %3 = vector.broadcast %1 : vector<1x16xf32> to vector<30x16xf32>
    %4 = arith.mulf %2, %3 : vector<30x16xf32>
    %c0_3 = arith.constant 0 : index
    %c0_4 = arith.constant 0 : index
    %5 = vector.load %arg2[%c0_3, %c0_4] : memref<1x16xf32, #tpu.memory_space<vmem>>, vector<1x16xf32>
    %6 = vector.broadcast %5 : vector<1x16xf32> to vector<30x16xf32>
    %7 = arith.addf %4, %6 : vector<30x16xf32>
    %cst = arith.constant 0.000000e+00 : f32
    %8 = vector.broadcast %cst : f32 to vector<30x16xf32>
    %9 = arith.maximumf %7, %8 : vector<30x16xf32>
    %10 = vector.extract_strided_slice %9 {offsets = [0, 0], sizes = [24, 16], strides = [1, 1]} : vector<30x16xf32> to vector<24x16xf32>
    %11 = vector.extract_strided_slice %9 {offsets = [6, 0], sizes = [24, 16], strides = [1, 1]} : vector<30x16xf32> to vector<24x16xf32>
    %12 = tpu.concatenate %10, %11 in 1 : vector<24x16xf32>, vector<24x16xf32> -> vector<24x32xf32>
    %c0_5 = arith.constant 0 : index
    %c0_6 = arith.constant 0 : index
    %13 = vector.load %arg3[%c0_5, %c0_6] : memref<32x64xbf16, #tpu.memory_space<vmem>>, vector<32x64xbf16>
    %14 = arith.truncf %12 : vector<24x32xf32> to vector<24x32xbf16>
    %cst_7 = arith.constant dense<0.000000e+00> : vector<24x64xf32>
    %15 = tpu.matmul %14, %13, %cst_7 {dimension_numbers = #tpu.dot_dimension_numbers<[1], [0], [0], [1], [0, 0, 1, 1], [], []>} : vector<24x32xbf16>, vector<32x64xbf16>, vector<24x64xf32> -> vector<24x64xf32>
    %c0_8 = arith.constant 0 : index
    %c0_9 = arith.constant 0 : index
    %16 = vector.load %arg4[%c0_8, %c0_9] : memref<1x64xf32, #tpu.memory_space<vmem>>, vector<1x64xf32>
    %17 = vector.broadcast %16 : vector<1x64xf32> to vector<24x64xf32>
    %18 = arith.addf %15, %17 : vector<24x64xf32>
    %cst_10 = arith.constant 0.000000e+00 : f32
    %19 = vector.broadcast %cst_10 : f32 to vector<24x64xf32>
    %20 = arith.maximumf %18, %19 : vector<24x64xf32>
    %21 = vector.extract_strided_slice %20 {offsets = [0, 0], sizes = [22, 64], strides = [1, 1]} : vector<24x64xf32> to vector<22x64xf32>
    %22 = vector.extract_strided_slice %20 {offsets = [2, 0], sizes = [22, 64], strides = [1, 1]} : vector<24x64xf32> to vector<22x64xf32>
    %23 = tpu.concatenate %21, %22 in 1 : vector<22x64xf32>, vector<22x64xf32> -> vector<22x128xf32>
    %c0_11 = arith.constant 0 : index
    %c0_12 = arith.constant 0 : index
    %24 = vector.load %arg5[%c0_11, %c0_12] : memref<128x128xbf16, #tpu.memory_space<vmem>>, vector<128x128xbf16>
    %25 = arith.truncf %23 : vector<22x128xf32> to vector<22x128xbf16>
    %cst_13 = arith.constant dense<0.000000e+00> : vector<22x128xf32>
    %26 = tpu.matmul %25, %24, %cst_13 {dimension_numbers = #tpu.dot_dimension_numbers<[1], [0], [0], [1], [0, 0, 1, 1], [], []>} : vector<22x128xbf16>, vector<128x128xbf16>, vector<22x128xf32> -> vector<22x128xf32>
    %c0_14 = arith.constant 0 : index
    %c0_15 = arith.constant 0 : index
    %27 = vector.load %arg6[%c0_14, %c0_15] : memref<1x128xf32, #tpu.memory_space<vmem>>, vector<1x128xf32>
    %28 = vector.broadcast %27 : vector<1x128xf32> to vector<22x128xf32>
    %29 = arith.addf %26, %28 : vector<22x128xf32>
    %cst_16 = arith.constant 0.000000e+00 : f32
    %30 = vector.broadcast %cst_16 : f32 to vector<22x128xf32>
    %31 = arith.maximumf %29, %30 : vector<22x128xf32>
    %32 = vector.extract_strided_slice %31 {offsets = [0, 0], sizes = [16, 128], strides = [1, 1]} : vector<22x128xf32> to vector<16x128xf32>
    %33 = vector.extract_strided_slice %31 {offsets = [6, 0], sizes = [16, 128], strides = [1, 1]} : vector<22x128xf32> to vector<16x128xf32>
    %34 = tpu.concatenate %32, %33 in 1 : vector<16x128xf32>, vector<16x128xf32> -> vector<16x256xf32>
    %c0_17 = arith.constant 0 : index
    %c0_18 = arith.constant 0 : index
    %35 = vector.load %arg7[%c0_17, %c0_18] : memref<256x256xbf16, #tpu.memory_space<vmem>>, vector<256x256xbf16>
    %36 = arith.truncf %34 : vector<16x256xf32> to vector<16x256xbf16>
    %cst_19 = arith.constant dense<0.000000e+00> : vector<16x256xf32>
    %37 = tpu.matmul %36, %35, %cst_19 {dimension_numbers = #tpu.dot_dimension_numbers<[1], [0], [0], [1], [0, 0, 1, 1], [], []>} : vector<16x256xbf16>, vector<256x256xbf16>, vector<16x256xf32> -> vector<16x256xf32>
    %c0_20 = arith.constant 0 : index
    %c0_21 = arith.constant 0 : index
    %38 = vector.load %arg8[%c0_20, %c0_21] : memref<1x256xf32, #tpu.memory_space<vmem>>, vector<1x256xf32>
    %39 = vector.broadcast %38 : vector<1x256xf32> to vector<16x256xf32>
    %40 = arith.addf %37, %39 : vector<16x256xf32>
    %cst_22 = arith.constant 0.000000e+00 : f32
    %41 = vector.broadcast %cst_22 : f32 to vector<16x256xf32>
    %42 = arith.maximumf %40, %41 : vector<16x256xf32>
    %43 = vector.extract_strided_slice %42 {offsets = [0, 0], sizes = [2, 256], strides = [1, 1]} : vector<16x256xf32> to vector<2x256xf32>
    %44 = vector.extract_strided_slice %42 {offsets = [2, 0], sizes = [2, 256], strides = [1, 1]} : vector<16x256xf32> to vector<2x256xf32>
    %45 = vector.extract_strided_slice %42 {offsets = [6, 0], sizes = [2, 256], strides = [1, 1]} : vector<16x256xf32> to vector<2x256xf32>
    %46 = vector.extract_strided_slice %42 {offsets = [8, 0], sizes = [2, 256], strides = [1, 1]} : vector<16x256xf32> to vector<2x256xf32>
    %47 = vector.extract_strided_slice %42 {offsets = [12, 0], sizes = [2, 256], strides = [1, 1]} : vector<16x256xf32> to vector<2x256xf32>
    %48 = vector.extract_strided_slice %42 {offsets = [14, 0], sizes = [2, 256], strides = [1, 1]} : vector<16x256xf32> to vector<2x256xf32>
    %49 = tpu.concatenate %43, %44, %45, %46, %47, %48 in 1 : vector<2x256xf32>, vector<2x256xf32>, vector<2x256xf32>, vector<2x256xf32>, vector<2x256xf32>, vector<2x256xf32> -> vector<2x1536xf32>
    %c0_23 = arith.constant 0 : index
    %c0_24 = arith.constant 0 : index
    %50 = vector.load %arg9[%c0_23, %c0_24] : memref<1536x256xbf16, #tpu.memory_space<vmem>>, vector<1536x256xbf16>
    %51 = arith.truncf %49 : vector<2x1536xf32> to vector<2x1536xbf16>
    %cst_25 = arith.constant dense<0.000000e+00> : vector<2x256xf32>
    %52 = tpu.matmul %51, %50, %cst_25 {dimension_numbers = #tpu.dot_dimension_numbers<[1], [0], [0], [1], [0, 0, 1, 1], [], []>} : vector<2x1536xbf16>, vector<1536x256xbf16>, vector<2x256xf32> -> vector<2x256xf32>
    %c0_26 = arith.constant 0 : index
    %c0_27 = arith.constant 0 : index
    %53 = vector.load %arg10[%c0_26, %c0_27] : memref<1x256xf32, #tpu.memory_space<vmem>>, vector<1x256xf32>
    %54 = vector.broadcast %53 : vector<1x256xf32> to vector<2x256xf32>
    %55 = arith.addf %52, %54 : vector<2x256xf32>
    %cst_28 = arith.constant 0.000000e+00 : f32
    %56 = vector.broadcast %cst_28 : f32 to vector<2x256xf32>
    %57 = arith.maximumf %55, %56 : vector<2x256xf32>
    %c0_29 = arith.constant 0 : index
    %c0_30 = arith.constant 0 : index
    %58 = vector.load %arg11[%c0_29, %c0_30] : memref<256x32xbf16, #tpu.memory_space<vmem>>, vector<256x32xbf16>
    %59 = arith.truncf %57 : vector<2x256xf32> to vector<2x256xbf16>
    %cst_31 = arith.constant dense<0.000000e+00> : vector<2x32xf32>
    %60 = tpu.matmul %59, %58, %cst_31 {dimension_numbers = #tpu.dot_dimension_numbers<[1], [0], [0], [1], [0, 0, 1, 1], [], []>} : vector<2x256xbf16>, vector<256x32xbf16>, vector<2x32xf32> -> vector<2x32xf32>
    %c0_32 = arith.constant 0 : index
    %c0_33 = arith.constant 0 : index
    %61 = vector.load %arg12[%c0_32, %c0_33] : memref<1x32xf32, #tpu.memory_space<vmem>>, vector<1x32xf32>
    %62 = vector.broadcast %61 : vector<1x32xf32> to vector<2x32xf32>
    %63 = arith.addf %60, %62 : vector<2x32xf32>
    %cst_34 = arith.constant 0.000000e+00 : f32
    %64 = vector.broadcast %cst_34 : f32 to vector<2x32xf32>
    %65 = arith.maximumf %63, %64 : vector<2x32xf32>
    %c0_35 = arith.constant 0 : index
    %c0_36 = arith.constant 0 : index
    %66 = vector.load %arg13[%c0_35, %c0_36] : memref<32x4xf32, #tpu.memory_space<vmem>>, vector<32x4xf32>
    %cst_37 = arith.constant dense<0.000000e+00> : vector<2x4xf32>
    %67 = tpu.matmul %65, %66, %cst_37 {dimension_numbers = #tpu.dot_dimension_numbers<[1], [0], [0], [1], [0, 0, 1, 1], [], []>} : vector<2x32xf32>, vector<32x4xf32>, vector<2x4xf32> -> vector<2x4xf32>
    %c0_38 = arith.constant 0 : index
    %c0_39 = arith.constant 0 : index
    %68 = vector.load %arg14[%c0_38, %c0_39] : memref<1x4xf32, #tpu.memory_space<vmem>>, vector<1x4xf32>
    %69 = vector.broadcast %68 : vector<1x4xf32> to vector<2x4xf32>
    %70 = arith.addf %67, %69 : vector<2x4xf32>
    %cst_40 = arith.constant dense<0xFF800000> : vector<2xf32>
    %71 = vector.multi_reduction <maximumf>, %70, %cst_40 [1] : vector<2x4xf32> to vector<2xf32>
    %72 = vector.shape_cast %71 : vector<2xf32> to vector<2x1xf32>
    %73 = vector.broadcast %72 : vector<2x1xf32> to vector<2x4xf32>
    %74 = arith.subf %70, %73 : vector<2x4xf32>
    %75 = math.exp %74 : vector<2x4xf32>
    %cst_41 = arith.constant dense<0.000000e+00> : vector<2xf32>
    %76 = vector.multi_reduction <add>, %75, %cst_41 [1] : vector<2x4xf32> to vector<2xf32>
    %77 = vector.shape_cast %76 : vector<2xf32> to vector<2x1xf32>
    %78 = math.log %77 : vector<2x1xf32>
    %79 = vector.broadcast %78 : vector<2x1xf32> to vector<2x4xf32>
    %80 = arith.subf %74, %79 : vector<2x4xf32>
    %c0_42 = arith.constant 0 : index
    %c0_43 = arith.constant 0 : index
    %81 = vector.load %arg15[%c0_42, %c0_43] : memref<2x4xf32, #tpu.memory_space<vmem>>, vector<2x4xf32>
    tpu.vector_store %arg15[%c0_42, %c0_43], %80 {strides = array<i32>} : memref<2x4xf32, #tpu.memory_space<vmem>>, vector<2x4xf32>,
    return
  }
}

</mosaic_0001>

<bundles_post_ra>
// kernel: forward.1
= control target key start
LH: loop header
LB: loop body
LE: loop exit
PB: predicated region body
PF: predicated region fallthrough
CT: control target
= control target key end

     0   :  { %20 = vsyncpa [#allocation3], 0  ;;  %s3584_s0 = inlined_call_operand.vmem [shape: f32[30,1], index: 0, kind: input, shape index: {}]   ;;  %s3585_s1 = inlined_call_operand.vmem [shape: f32[1,16], index: 1, kind: input, shape index: {}]   ;;  %s3586_s2 = inlined_call_operand.vmem [shape: f32[1,16], index: 2, kind: input, shape index: {}]   ;;  %s3587_s3 = inlined_call_operand.vmem [shape: bf16[32,64], index: 3, kind: input, shape index: {}]   ;;  %s3588_s4 = inlined_call_operand.vmem [shape: f32[1,64], index: 4, kind: input, shape index: {}]   ;;  %s3589_s5 = inlined_call_operand.hbm [shape: bf16[128,128], index: 5, kind: input, shape index: {}]   ;;  %s3590_s6 = inlined_call_operand.vmem [shape: f32[1,128], index: 6, kind: input, shape index: {}]   ;;  %s3591_s7 = inlined_call_operand.vmem [shape: bf16[256,256], index: 7, kind: input, shape index: {}]   ;;  %s3592_s8 = inlined_call_operand.vmem [shape: f32[1,256], index: 8, kind: input, shape index: {}]   ;;  %s3593_s9 = inlined_call_operand.hbm [shape: bf16[1536,256], index: 9, kind: input, shape index: {}]   ;;  %s3594_s10 = inlined_call_operand.vmem [shape: f32[1,256], index: 10, kind: input, shape index: {}]   ;;  %s3595_s11 = inlined_call_operand.vmem [shape: bf16[256,32], index: 11, kind: input, shape index: {}]   ;;  %s3596_s12 = inlined_call_operand.vmem [shape: f32[1,32], index: 12, kind: input, shape index: {}]   ;;  %s3597_s13 = inlined_call_operand.vmem [shape: f32[32,4], index: 13, kind: input, shape index: {}]   ;;  %s3598_s14 = inlined_call_operand.vmem [shape: f32[1,4], index: 14, kind: input, shape index: {}]   ;;  %s3599_s15 = inlined_call_operand.hbm [shape: f32[2,4], index: 15, kind: output, shape index: {}]  }
   0x1   :  { %21 = vsyncpa [#allocation6], 0 }
   0x2   :  { %22 = vsyncpa [#allocation4], 0  ;;  %s3210_s18 = smov [#allocation2]   ;;  %s3138_s22 = scalar_lea.hbm %s3589_s5, 1024 }
   0x3   :  { %s38_s19 = sshll.u32 %s3210_s18, 4  ;;  %p3139_p0 = scmp.ne.s32.totalorder %s3589_s5, %s3138_s22  ;;  %s39_s19 = int_to_ptr.vmem [resolvable:$true] %s38_s19 }
   0x4   :  { %p3142_p1 = scmp.lt.u32.totalorder %s3138_s22, %s3589_s5 }
   0x6   :  { %p3144_p2 = pnand %p3142_p1, %p3139_p0 }
   0x8   :  { %3147 = shalt.err (!%p3144_p2)
}
   0x9   :  { %s3148_s27 = scalar_lea.vmem %s39_s19, 1024  ;;  %p3153_p4 = scmp.lt.s32.totalorder %s39_s19, %s39_s19 }
   0xa   :  { %p3149_p3 = scmp.ne.s32.totalorder %s39_s19, %s3148_s27  ;;  %p3154_p5 = scmp.lt.s32.totalorder %s3148_s27, %s3148_s27 }
   0xc   :  { %p3155_p6 = por %p3154_p5, %p3153_p4 }
   0xe   :  { %p3156_p7 = pnand %p3155_p6, %p3149_p3 }
  0x10   :  { %3159 = shalt.err (!%p3156_p7)
}
  0x11   :  { %s3211_s28 = smov 64   ;;  %s3212_s29 = smov 4  }
  0x12   :  { %44 = dma.hbm_to_vmem [thread:$0]  %s3589_s5, 1024, %s39_s19, [#allocation3], %s3211_s28, %s3211_s28, %s3212_s29  }
  0x13   :  { %s3213_s17 = smov [#allocation5]   ;;  %s3160_s22 = scalar_lea.hbm %s3593_s9, 24576 }
  0x14   :  { %s56_s18 = sshll.u32 %s3213_s17, 4  ;;  %p3161_p8 = scmp.ne.s32.totalorder %s3593_s9, %s3160_s22  ;;  %s57_s18 = int_to_ptr.vmem [resolvable:$true] %s56_s18 }
  0x15   :  { %p3164_p9 = scmp.lt.u32.totalorder %s3160_s22, %s3593_s9 }
  0x17   :  { %p3166_p10 = pnand %p3164_p9, %p3161_p8 }
  0x19   :  { %3169 = shalt.err (!%p3166_p10)
}
  0x1a   :  { %s3170_s27 = scalar_lea.vmem %s57_s18, 24576  ;;  %p3175_p12 = scmp.lt.s32.totalorder %s57_s18, %s57_s18 }
  0x1b   :  { %p3171_p11 = scmp.ne.s32.totalorder %s57_s18, %s3170_s27  ;;  %p3176_p13 = scmp.lt.s32.totalorder %s3170_s27, %s3170_s27 }
  0x1d   :  { %p3177_p0 = por %p3176_p13, %p3175_p12 }
  0x1f   :  { %p3178_p1 = pnand %p3177_p0, %p3171_p11 }
  0x21   :  { %3181 = shalt.err (!%p3178_p1)
}
  0x22   :  { %s3214_s5 = smov 128   ;;  %s3215_s19 = smov 8  }
  0x23   :  { %62 = dma.hbm_to_vmem [thread:$0]  %s3593_s9, 24576, %s57_s18, [#allocation6], %s3214_s5, %s3214_s5, %s3215_s19  }
  0x24   :  { %3204 = dma.done.wait [#allocation3], 1024  }
  0x25   :  { %3205 = vsyncadd [#allocation3], 4294966272 }
  0x26   :  { %3206 = dma.done.wait [#allocation6], 24576  }
  0x27   :  { %3207 = vsyncadd [#allocation6], 4294942720  ;;  %v3216_v0 = vmov 0   ;;  %v82_v1 = vld [vmem:[%s3584_s0 + $0x10] sm:$0xff]  ;;  %v80_v2 = vld [vmem:[%s3584_s0] sm:$0xff]  ;;  %vm134_vm0 = vcmask 1041408  }
  0x28   :  { %2761 = vset.pattern.permute.xlu1 %v3216_v0  ;;  %2760 = vset.pattern.permute.xlu0 %v3216_v0  ;;  %v83_v3 = vld [vmem:[%s3584_s0 + $0x18] sm:$0x3f]  ;;  %v81_v4 = vld [vmem:[%s3584_s0 + $0x8] sm:$0xff]  ;;  %v2383_v5 = vld [vmem:[%s3585_s1] ss:$0 sm:$0xff]  ;;  %s3217_s1 = smov 16  }
  0x29   :  { %97 = vperm.xlu1 %2761, %v82_v1   ;;  %87 = vperm.xlu0 %2760, %v80_v2   ;;  %v2772_v6 = vld [vmem:[%s3587_s3] sm:$0xff]   ;;  %v2773_v14 = vld [vmem:[%s3587_s3 + $0x8] sm:$0xff]   ;;  %vm151_vm1 = vcmask 130048   ;;  %vm180_vm2 = vcmask 261120   ;;  %v2776_v44 = vld [vmem:[#allocation2 + $0x10] sm:$0xff]   ;;  %vm241_vm3 = vcmask 1045504  }
  0x2a   :  { %v2384_v7 = vld [vmem:[%s3586_s2] ss:$0 sm:$0xff]  ;;  %2683 = vmatprep.subr.bf16.mxu1 %v2772_v6  ;;  %v2775_v43 = vld [vmem:[#allocation2 + $0x8] sm:$0xff]   ;;  %v2777_v45 = vld [vmem:[#allocation2 + $0x18] sm:$0xff]   ;;  %vm256_vm4 = vcmask 523264   ;;  %vm3219_vm5 = vmmov 0  }
  0x2b   :  { %2684 = vmatpush3.bf16.msra.mxu1 %v2772_v6  ;;  %v2774_v42 = vld [vmem:[#allocation2] sm:$0xff]   ;;  %v2779_v47 = vld [vmem:[#allocation2 + $0x28] sm:$0xff]   ;;  %v2780_v48 = vld [vmem:[#allocation2 + $0x30] sm:$0xff]   ;;  %vm2353_vm6 = vcmask 25600  }
  0x2c   :  { %2685 = vmatprep.subr.bf16.mxu1 %v2773_v14  ;;  %2691 = vmatprep.subr.bf16.mxu0 %v2774_v42  ;;  %v2778_v46 = vld [vmem:[#allocation2 + $0x20] sm:$0xff]   ;;  %v2781_v51 = vld [vmem:[#allocation2 + $0x38] sm:$0xff]  }
  0x2d   :  { %102 = vperm.xlu1 %2761, %v83_v3   ;;  %92 = vperm.xlu0 %2760, %v81_v4   ;;  %v2385_v49 = vld [vmem:[%s3588_s4] ss:$0 sm:$0xff]  ;;  %v2784_v62 = vld [vmem:[%s3591_s7 + $0x4] ss:$8 sps:$4 sm:$0xff]  }
  0x2e   :  { %2692 = vmatpush3.bf16.msra.mxu0 %v2774_v42  ;;  %v2827_v42 = vld [vmem:[%s3591_s7 + $0xf0] ss:$8 sps:$4 sm:$0xff]  }
  0x2f   :  { %2686 = vmatpush3.bf16.msra.mxu1 %v2773_v14  ;;  %2693 = vmatprep.subr.bf16.mxu0 %v2775_v43  ;;  %v2787_v14 = vld [vmem:[%s3591_s7 + $0x14] ss:$8 sps:$4 sm:$0xff]  }
  0x32   :  { %2694 = vmatpush3.bf16.msra.mxu0 %v2775_v43  ;;  %v2829_v43 = vld [vmem:[%s3591_s7 + $0xf4] ss:$8 sps:$4 sm:$0xff]  }
  0x33   :  { %2695 = vmatprep.subr.bf16.mxu0 %v2776_v44 }
  0x36   :  { %2696 = vmatpush3.bf16.msra.mxu0 %v2776_v44  ;;  %v2832_v44 = vld [vmem:[#allocation5 + $0x4] ss:$8 sps:$4 sm:$0xff]  }
  0x37   :  { %2697 = vmatprep.subr.bf16.mxu0 %v2777_v45 }
  0x3a   :  { %2698 = vmatpush3.bf16.msra.mxu0 %v2777_v45  ;;  %v2833_v45 = vld [vmem:[#allocation5 + $0x200] ss:$8 sps:$4 sm:$0xff]  }
  0x3b   :  { %2699 = vmatprep.subr.bf16.mxu0 %v2778_v46 }
  0x3e   :  { %2700 = vmatpush3.bf16.msra.mxu0 %v2778_v46  ;;  %v2835_v46 = vld [vmem:[#allocation5 + $0x204] ss:$8 sps:$4 sm:$0xff]  }
  0x3f   :  { %2701 = vmatprep.subr.bf16.mxu0 %v2779_v47  ;;  %1925 = vmatprep.subr.bf16.mxu1 %v2835_v46  ;;  %v2892_v46 = vld [vmem:[#allocation5 + $0xa4] ss:$8 sps:$4 sm:$0xff]  }
  0x42   :  { %2702 = vmatpush3.bf16.msra.mxu0 %v2779_v47  ;;  %v2839_v47 = vld [vmem:[#allocation5 + $0x210] ss:$8 sps:$4 sm:$0xff]  }
  0x43   :  { %2703 = vmatprep.subr.bf16.mxu0 %v2780_v48 }
  0x46   :  { %2704 = vmatpush3.bf16.msra.mxu0 %v2780_v48  ;;  %v2841_v48 = vld [vmem:[#allocation5 + $0x214] ss:$8 sps:$4 sm:$0xff]  }
  0x47   :  { %2705 = vmatprep.subr.bf16.mxu0 %v2781_v51 }
  0x4a   :  { %2706 = vmatpush3.bf16.msra.mxu0 %v2781_v51  ;;  %v2851_v51 = vld [vmem:[#allocation5 + $0x230] ss:$8 sps:$4 sm:$0xff]  }
  0x4b   :  { %600 = vmatprep.subr.bf16.mxu0 %v2784_v62  ;;  %v2883_v62 = vld [vmem:[#allocation5 + $0x284] ss:$8 sps:$4 sm:$0xff]  }
  0xa8   :  { %v98_v8 = vpop.permute.xlu1 %97  ;;  %v88_v9 = vpop.permute.xlu0 %87 }
  0xa9   :  { %v113_v10 = vmul.f32 %v2383_v5, %v98_v8  ;;  %v111_v11 = vmul.f32 %v2383_v5, %v88_v9 }
  0xab   :  { %v124_v12 = vadd.f32 %v2384_v7, %v113_v10  ;;  %v122_v13 = vadd.f32 %v2384_v7, %v111_v11 }
  0xac   :  { %v103_v15 = vpop.permute.xlu1 %102  ;;  %v93_v16 = vpop.permute.xlu0 %92 }
  0xad   :  { %v128_v17 = vmax.f32 %v124_v12, 0.0  ;;  %v114_v18 = vmul.f32 %v2383_v5, %v103_v15  ;;  %v112_v19 = vmul.f32 %v2383_v5, %v93_v16  ;;  %v126_v20 = vmax.f32 %v122_v13, 0.0  ;;  %v2782_v12 = vld [vmem:[%s3591_s7] ss:$8 sps:$4 sm:$0xff]   ;;  %v2785_v15 = vld [vmem:[%s3591_s7 + $0x10] ss:$8 sps:$4 sm:$0xff]  }
  0xae   :  { %v2790_v16 = vld [vmem:[%s3591_s7 + $0x24] ss:$8 sps:$4 sm:$0xff]  }
  0xaf   :  { %v125_v21 = vadd.f32 %v2384_v7, %v114_v18  ;;  %v123_v22 = vadd.f32 %v2384_v7, %v112_v19  ;;  %v138_v23 = vrot.slane %v128_v17, 6  ;;  %v135_v26 = vrot.slane %v126_v20, 6  ;;  %v2793_v18 = vld [vmem:[%s3591_s7 + $0x34] ss:$8 sps:$4 sm:$0xff]   ;;  %v2791_v19 = vld [vmem:[%s3591_s7 + $0x30] ss:$8 sps:$4 sm:$0xff]  }
  0xb1   :  { %v129_v24 = vmax.f32 %v125_v21, 0.0  ;;  %v127_v25 = vmax.f32 %v123_v22, 0.0  ;;  %v2794_v21 = vld [vmem:[%s3591_s7 + $0x40] ss:$8 sps:$4 sm:$0xff]   ;;  %v2799_v22 = vld [vmem:[%s3591_s7 + $0x54] ss:$8 sps:$4 sm:$0xff]  }
  0xb3   :  { %v140_v27 = vrot.slane %v129_v24, 6  ;;  %v136_v28 = vrot.slane %v127_v25, 6  ;;  %v2802_v24 = vld [vmem:[%s3591_s7 + $0x64] ss:$8 sps:$4 sm:$0xff]  }
  0xb5   :  { %v141_v29 = vsel %vm134_vm0, %v138_v23, %v140_v27  ;;  %v137_v30 = vsel %vm134_vm0, %v135_v26, %v136_v28  ;;  %v139_v31 = vsel %vm134_vm0, %v136_v28, %v138_v23  ;;  %v2797_v23 = vld [vmem:[%s3591_s7 + $0x50] ss:$8 sps:$4 sm:$0xff]   ;;  %v2805_v26 = vld [vmem:[%s3591_s7 + $0x74] ss:$8 sps:$4 sm:$0xff]   ;;  %v2808_v28 = vld [vmem:[%s3591_s7 + $0x84] ss:$8 sps:$4 sm:$0xff]  }
  0xb6   :  { %146 = vrot.lane.b32.xlu1 %v141_v29, %s3217_s1  ;;  %v2762_v32 = vpack.i.bf16 %v139_v31, %v137_v30  ;;  %v2803_v27 = vld [vmem:[%s3591_s7 + $0x70] ss:$8 sps:$4 sm:$0xff]   ;;  %v2806_v29 = vld [vmem:[%s3591_s7 + $0x80] ss:$8 sps:$4 sm:$0xff]   ;;  %v2811_v30 = vld [vmem:[%s3591_s7 + $0x94] ss:$8 sps:$4 sm:$0xff]  }
  0xb7   :  { %v2809_v31 = vld [vmem:[%s3591_s7 + $0x90] ss:$8 sps:$4 sm:$0xff]  }
  0xb8   :  { %2763 = vrot.lane.b32.xlu0 %v2762_v32, %s3217_s1  ;;  %v2814_v32 = vld [vmem:[%s3591_s7 + $0xa4] ss:$8 sps:$4 sm:$0xff]  }
 0x128   :  { %v147_v33 = vpop.permute.xlu1 %146 }
 0x129   :  { %v154_v37 = vsel %vm151_vm1, %v128_v17, %v147_v33  ;;  %v2788_v17 = vld [vmem:[%s3591_s7 + $0x20] ss:$8 sps:$4 sm:$0xff]  }
 0x12a   :  { %v2764_v34 = vpop.permute.xlu0 %2763  ;;  %v160_v41 = vpack.c.bf16 %v154_v37, %v154_v37  ;;  %v2812_v33 = vld [vmem:[%s3591_s7 + $0xa0] ss:$8 sps:$4 sm:$0xff]  }
 0x12b   :  { %v2766_v35 = vunpack.i.h.bf16 %v2764_v34  ;;  %v2765_v36 = vunpack.i.l.bf16 %v2764_v34  ;;  %v2817_v34 = vld [vmem:[%s3591_s7 + $0xb4] ss:$8 sps:$4 sm:$0xff]   ;;  %v2818_v37 = vld [vmem:[%s3591_s7 + $0xc0] ss:$8 sps:$4 sm:$0xff]  }
 0x12d   :  { %v152_v38 = vsel %vm151_vm1, %v126_v20, %v2765_v36  ;;  %v153_v39 = vsel %vm151_vm1, %v127_v25, %v2766_v35  ;;  %v2796_v20 = vld [vmem:[%s3591_s7 + $0x44] ss:$8 sps:$4 sm:$0xff]   ;;  %v2800_v25 = vld [vmem:[%s3591_s7 + $0x60] ss:$8 sps:$4 sm:$0xff]   ;;  %v2815_v35 = vld [vmem:[%s3591_s7 + $0xb0] ss:$8 sps:$4 sm:$0xff]  }
 0x12e   :  { %v159_v40 = vpack.c.bf16 %v153_v39, %v152_v38  ;;  %v2820_v36 = vld [vmem:[%s3591_s7 + $0xc4] ss:$8 sps:$4 sm:$0xff]   ;;  %v2823_v38 = vld [vmem:[%s3591_s7 + $0xd4] ss:$8 sps:$4 sm:$0xff]   ;;  %v2821_v39 = vld [vmem:[%s3591_s7 + $0xd0] ss:$8 sps:$4 sm:$0xff]  }
 0x130   :  { %2687 = vmatprep.mubr.msk.bf16.mxu1 %vm180_vm2, %v159_v40  ;;  %v2826_v40 = vld [vmem:[%s3591_s7 + $0xe4] ss:$8 sps:$4 sm:$0xff]  }
 0x131   :  { %2688 = vmatmul.mubr.msk.bf16.vlgmr.msra.gmra.mrb[0].mxu1 %vm180_vm2, %v160_v41  ;;  %v2824_v41 = vld [vmem:[%s3591_s7 + $0xe0] ss:$8 sps:$4 sm:$0xff]  }
 0x132   :  { %1926 = vmatpush1.bf16.msra.mxu1 %v2833_v45  ;;  %v2884_v45 = vld [vmem:[#allocation5 + $0x90] ss:$8 sps:$4 sm:$0xff]  }
 0x133   :  { %1927 = vmatprep.subr.bf16.mxu1 %v2841_v48  ;;  %v2898_v48 = vld [vmem:[#allocation5 + $0xb4] ss:$8 sps:$4 sm:$0xff]  }
 0x136   :  { %1928 = vmatpush1.bf16.msra.mxu1 %v2839_v47  ;;  %v2890_v47 = vld [vmem:[#allocation5 + $0xa0] ss:$8 sps:$4 sm:$0xff]  }
 0x204   :  { %v2689_v50 = vpop.f32.mrb[0].mxu1 }
 0x205   :  { %v230_v52 = vadd.f32 %v2689_v50, %v2385_v49  ;;  %v221_v53 = vpop.f32.mrb[1].mxu1  ;;  %v2847_v50 = vld [vmem:[#allocation5 + $0x224] ss:$8 sps:$4 sm:$0xff]  }
 0x206   :  { %v222_v54 = vadd.f32 %v2385_v49, %v221_v53  ;;  %v2690_v55 = vpop.f32.mrb[2].mxu1  ;;  %1929 = vmatprep.subr.bf16.mxu1 %v2847_v50  ;;  %v2857_v53 = vld [vmem:[#allocation5 + $0x240] ss:$8 sps:$4 sm:$0xff]   ;;  %v2904_v50 = vld [vmem:[#allocation5 + $0xc4] ss:$8 sps:$4 sm:$0xff]  }
 0x207   :  { %v237_v56 = vmax.f32 %v230_v52, 0.0  ;;  %v224_v57 = vpop.f32.mrb[3].mxu1  ;;  %v2853_v52 = vld [vmem:[#allocation5 + $0x234] ss:$8 sps:$4 sm:$0xff]   ;;  %v2863_v55 = vld [vmem:[#allocation5 + $0x250] ss:$8 sps:$4 sm:$0xff]  }
 0x208   :  { %v235_v58 = vmax.f32 %v222_v54, 0.0  ;;  %v225_v59 = vadd.f32 %v2385_v49, %v224_v57  ;;  %v2845_v49 = vld [vmem:[#allocation5 + $0x220] ss:$8 sps:$4 sm:$0xff]   ;;  %v2859_v54 = vld [vmem:[#allocation5 + $0x244] ss:$8 sps:$4 sm:$0xff]  }
 0x209   :  { %v245_v60 = vrot.slane %v237_v56, 2  ;;  %1930 = vmatpush1.bf16.msra.mxu1 %v2845_v49  ;;  %v2869_v57 = vld [vmem:[#allocation5 + $0x260] ss:$8 sps:$4 sm:$0xff]   ;;  %v2896_v49 = vld [vmem:[#allocation5 + $0xb0] ss:$8 sps:$4 sm:$0xff]  }
 0x20a   :  { %v236_v61 = vmax.f32 %v225_v59, 0.0  ;;  %v242_v63 = vrot.slane %v235_v58, 2  ;;  %1931 = vmatprep.subr.bf16.mxu1 %v2853_v52  ;;  %v2875_v59 = vld [vmem:[#allocation5 + $0x270] ss:$8 sps:$4 sm:$0xff]   ;;  %v2910_v52 = vld [vmem:[#allocation5 + $0xd4] ss:$8 sps:$4 sm:$0xff]  }
 0x20b   :  { %251 = vrot.lane.b32.xlu1 %v245_v60, %s3211_s28 }
 0x20c   :  { %v243_v0 = vrot.slane %v236_v61, 2 }
 0x20d   :  { %1932 = vmatpush1.bf16.msra.mxu1 %v2851_v51  ;;  %v2902_v51 = vld [vmem:[#allocation5 + $0xc0] ss:$8 sps:$4 sm:$0xff]  }
 0x20e   :  { %v244_v1 = vsel %vm241_vm3, %v242_v63, %v243_v0  ;;  %v246_v2 = vsel %vm241_vm3, %v243_v0, %v245_v60  ;;  %1933 = vmatprep.subr.bf16.mxu1 %v2859_v54  ;;  %v2877_v60 = vld [vmem:[#allocation5 + $0x274] ss:$8 sps:$4 sm:$0xff]   ;;  %v2887_v63 = vld [vmem:[#allocation5 + $0x290] ss:$8 sps:$4 sm:$0xff]   ;;  %v2916_v54 = vld [vmem:[#allocation5 + $0xe4] ss:$8 sps:$4 sm:$0xff]  }
 0x20f   :  { %v2767_v3 = vpack.i.bf16 %v246_v2, %v244_v1  ;;  %v2889_v0 = vld [vmem:[#allocation5 + $0x294] ss:$8 sps:$4 sm:$0xff]   ;;  %v2893_v1 = vld [vmem:[#allocation5 + $0x2a0] ss:$8 sps:$4 sm:$0xff]   ;;  %v2895_v2 = vld [vmem:[#allocation5 + $0x2a4] ss:$8 sps:$4 sm:$0xff]  }
 0x211   :  { %2768 = vrot.lane.b32.xlu0 %v2767_v3, %s3211_s28  ;;  %1934 = vmatpush1.bf16.msra.mxu1 %v2857_v53  ;;  %v2899_v3 = vld [vmem:[#allocation5 + $0x2b0] ss:$8 sps:$4 sm:$0xff]  }
 0x212   :  { %v2908_v53 = vld [vmem:[#allocation5 + $0xd0] ss:$8 sps:$4 sm:$0xff]  }
 0x27d   :  { %v252_v4 = vpop.permute.xlu1 %251 }
 0x27e   :  { %v259_v8 = vsel %vm256_vm4, %v237_v56, %v252_v4  ;;  %v2865_v56 = vld [vmem:[#allocation5 + $0x254] ss:$8 sps:$4 sm:$0xff]  }
 0x27f   :  { %v277_v13 = vpack.c.bf16 %v259_v8, %v259_v8  ;;  %1935 = vmatprep.subr.bf16.mxu1 %v2865_v56  ;;  %v2901_v4 = vld [vmem:[#allocation5 + $0x2b4] ss:$8 sps:$4 sm:$0xff]   ;;  %v2919_v56 = vld [vmem:[#allocation5 + $0x2e4] ss:$8 sps:$4 sm:$0xff]  }
 0x280   :  { %1936 = vmatpush1.bf16.msra.mxu1 %v2863_v55  ;;  %v2913_v8 = vld [vmem:[#allocation5 + $0x2d4] ss:$8 sps:$4 sm:$0xff]   ;;  %v2914_v55 = vld [vmem:[#allocation5 + $0xe0] ss:$8 sps:$4 sm:$0xff]  }
 0x283   :  { %v2769_v5 = vpop.permute.xlu0 %2768 }
 0x284   :  { %v2771_v6 = vunpack.i.h.bf16 %v2769_v5  ;;  %v2770_v7 = vunpack.i.l.bf16 %v2769_v5  ;;  %v2905_v5 = vld [vmem:[#allocation5 + $0x2c0] ss:$8 sps:$4 sm:$0xff]  }
 0x286   :  { %v257_v9 = vsel %vm256_vm4, %v235_v58, %v2770_v7  ;;  %v258_v10 = vsel %vm256_vm4, %v236_v61, %v2771_v6  ;;  %v2871_v58 = vld [vmem:[#allocation5 + $0x264] ss:$8 sps:$4 sm:$0xff]   ;;  %v2881_v61 = vld [vmem:[#allocation5 + $0x280] ss:$8 sps:$4 sm:$0xff]   ;;  %v2911_v7 = vld [vmem:[#allocation5 + $0x2d0] ss:$8 sps:$4 sm:$0xff]  }
 0x287   :  { %v276_v11 = vpack.c.bf16 %v258_v10, %v257_v9  ;;  %1937 = vmatprep.subr.bf16.mxu1 %v2871_v58  ;;  %v2907_v6 = vld [vmem:[#allocation5 + $0x2c4] ss:$8 sps:$4 sm:$0xff]   ;;  %v2390_v9 = vld [vmem:[%s3590_s6] ss:$0 sm:$0xff]  ;;  %v2922_v58 = vld [vmem:[#allocation5 + $0xf4] ss:$8 sps:$4 sm:$0xff]  }
 0x288   :  { %1938 = vmatpush1.bf16.msra.mxu1 %v2869_v57  ;;  %v2917_v57 = vld [vmem:[#allocation5 + $0x2e0] ss:$8 sps:$4 sm:$0xff]  }
 0x289   :  { %2707 = vmatprep.mubr.bf16.mxu0 %v276_v11  ;;  %1939 = vmatprep.subr.bf16.mxu1 %v2877_v60  ;;  %v2925_v60 = vld [vmem:[#allocation5 + $0x2f4] ss:$8 sps:$4 sm:$0xff]  }
 0x28a   :  { %2708 = vmatmul.mubr.bf16.vlgmr.msra.gmra.mrb[0].mxu0 %v277_v13 }
 0x28b   :  { %601 = vmatpush1.bf16.msra.mxu0 %v2782_v12 }
 0x28c   :  { %602 = vmatprep.subr.bf16.mxu0 %v2787_v14  ;;  %1940 = vmatpush1.bf16.msra.mxu1 %v2875_v59  ;;  %v2920_v59 = vld [vmem:[#allocation5 + $0xf0] ss:$8 sps:$4 sm:$0xff]  }
 0x28d   :  { %1941 = vmatprep.subr.bf16.mxu1 %v2883_v62  ;;  %v2928_v62 = vld [vmem:[#allocation5 + $0x104] ss:$8 sps:$4 sm:$0xff]  }
 0x28f   :  { %603 = vmatpush1.bf16.msra.mxu0 %v2785_v15 }
 0x290   :  { %604 = vmatprep.subr.bf16.mxu0 %v2790_v16  ;;  %1942 = vmatpush1.bf16.msra.mxu1 %v2881_v61  ;;  %v2923_v61 = vld [vmem:[#allocation5 + $0x2f0] ss:$8 sps:$4 sm:$0xff]  }
 0x291   :  { %1943 = vmatprep.subr.bf16.mxu1 %v2889_v0  ;;  %v430_v0 = vlaneseq }
 0x293   :  { %605 = vmatpush1.bf16.msra.mxu0 %v2788_v17 }
 0x294   :  { %606 = vmatprep.subr.bf16.mxu0 %v2793_v18  ;;  %1944 = vmatpush1.bf16.msra.mxu1 %v2887_v63  ;;  %v2931_v63 = vld [vmem:[#allocation5 + $0x304] ss:$8 sps:$4 sm:$0xff]  }
 0x295   :  { %1945 = vmatprep.subr.bf16.mxu1 %v2895_v2 }
 0x297   :  { %607 = vmatpush1.bf16.msra.mxu0 %v2791_v19 }
 0x298   :  { %608 = vmatprep.subr.bf16.mxu0 %v2796_v20  ;;  %1946 = vmatpush1.bf16.msra.mxu1 %v2893_v1  ;;  %v3463_v1 = vshrl.u32 %v430_v0, 7  ;;  %v2988_v0 = vld [vmem:[#allocation5 + $0x1a4] ss:$8 sps:$4 sm:$0xff]  }
 0x299   :  { %1947 = vmatprep.subr.bf16.mxu1 %v2901_v4 }
 0x29a   :  { %v432_v2 = vsub.s32 0, %v3463_v1  ;;  %v436_v4 = vsub.s32 1, %v3463_v1  ;;  %v2270_v1 = vld [vmem:[%s3597_s13 + $0x8] sm:$0xff] }
 0x29b   :  { %609 = vmatpush1.bf16.msra.mxu0 %v2794_v21 }
 0x29c   :  { %610 = vmatprep.subr.bf16.mxu0 %v2799_v22  ;;  %1948 = vmatpush1.bf16.msra.mxu1 %v2899_v3  ;;  %v428_v3 = vld [vmem:[%s3592_s8] sm:$0x3] }
 0x29d   :  { %1949 = vmatprep.subr.bf16.mxu1 %v2907_v6  ;;  %v437_v6 = vrot.slane %v428_v3, %v436_v4 }
 0x29f   :  { %611 = vmatpush1.bf16.msra.mxu0 %v2797_v23 }
 0x2a0   :  { %612 = vmatprep.subr.bf16.mxu0 %v2802_v24  ;;  %1950 = vmatpush1.bf16.msra.mxu1 %v2905_v5  ;;  %v433_v5 = vrot.slane %v428_v3, %v432_v2  ;;  %v2983_v3 = vld [vmem:[#allocation5 + $0x390] ss:$8 sps:$4 sm:$0xff]  }
 0x2a1   :  { %1951 = vmatprep.subr.bf16.mxu1 %v2913_v8 }
 0x2a3   :  { %613 = vmatpush1.bf16.msra.mxu0 %v2800_v25 }
 0x2a4   :  { %614 = vmatprep.subr.bf16.mxu0 %v2805_v26  ;;  %1952 = vmatpush1.bf16.msra.mxu1 %v2911_v7 }
 0x2a5   :  { %1953 = vmatprep.subr.bf16.mxu1 %v2919_v56  ;;  %v2976_v56 = vld [vmem:[#allocation5 + $0x184] ss:$8 sps:$4 sm:$0xff]  }
 0x2a7   :  { %615 = vmatpush1.bf16.msra.mxu0 %v2803_v27  ;;  %v2830_v27 = vld [vmem:[#allocation5] ss:$8 sps:$4 sm:$0xff]  }
 0x2a8   :  { %616 = vmatprep.subr.bf16.mxu0 %v2808_v28  ;;  %v2838_v28 = vld [vmem:[#allocation5 + $0x14] ss:$8 sps:$4 sm:$0xff]   ;;  %1954 = vmatpush1.bf16.msra.mxu1 %v2917_v57  ;;  %v2971_v57 = vld [vmem:[#allocation5 + $0x370] ss:$8 sps:$4 sm:$0xff]  }
 0x2a9   :  { %1955 = vmatprep.subr.bf16.mxu1 %v2925_v60  ;;  %v2982_v60 = vld [vmem:[#allocation5 + $0x194] ss:$8 sps:$4 sm:$0xff]  }
 0x2ab   :  { %617 = vmatpush1.bf16.msra.mxu0 %v2806_v29  ;;  %v2836_v29 = vld [vmem:[#allocation5 + $0x10] ss:$8 sps:$4 sm:$0xff]  }
 0x2ac   :  { %618 = vmatprep.subr.bf16.mxu0 %v2811_v30  ;;  %v2844_v30 = vld [vmem:[#allocation5 + $0x24] ss:$8 sps:$4 sm:$0xff]   ;;  %1956 = vmatpush1.bf16.msra.mxu1 %v2923_v61  ;;  %v2977_v61 = vld [vmem:[#allocation5 + $0x380] ss:$8 sps:$4 sm:$0xff]  }
 0x2ad   :  { %1966 = vmatprep.subr.bf16.mxu1 %v2931_v63  ;;  %v2985_v63 = vld [vmem:[#allocation5 + $0x394] ss:$8 sps:$4 sm:$0xff]  }
 0x2af   :  { %619 = vmatpush1.bf16.msra.mxu0 %v2809_v31  ;;  %v2842_v31 = vld [vmem:[#allocation5 + $0x20] ss:$8 sps:$4 sm:$0xff]  }
 0x2b0   :  { %620 = vmatprep.subr.bf16.mxu0 %v2814_v32  ;;  %v2850_v32 = vld [vmem:[#allocation5 + $0x34] ss:$8 sps:$4 sm:$0xff]  }
 0x2b3   :  { %621 = vmatpush1.bf16.msra.mxu0 %v2812_v33  ;;  %v2848_v33 = vld [vmem:[#allocation5 + $0x30] ss:$8 sps:$4 sm:$0xff]  }
 0x2b4   :  { %622 = vmatprep.subr.bf16.mxu0 %v2817_v34  ;;  %v2856_v34 = vld [vmem:[#allocation5 + $0x44] ss:$8 sps:$4 sm:$0xff]  }
 0x2b7   :  { %623 = vmatpush1.bf16.msra.mxu0 %v2815_v35  ;;  %v2854_v35 = vld [vmem:[#allocation5 + $0x40] ss:$8 sps:$4 sm:$0xff]  }
 0x2b8   :  { %624 = vmatprep.subr.bf16.mxu0 %v2820_v36  ;;  %v2862_v36 = vld [vmem:[#allocation5 + $0x54] ss:$8 sps:$4 sm:$0xff]  }
 0x2bb   :  { %625 = vmatpush1.bf16.msra.mxu0 %v2818_v37  ;;  %v2860_v37 = vld [vmem:[#allocation5 + $0x50] ss:$8 sps:$4 sm:$0xff]  }
 0x2bc   :  { %626 = vmatprep.subr.bf16.mxu0 %v2823_v38  ;;  %v2868_v38 = vld [vmem:[#allocation5 + $0x64] ss:$8 sps:$4 sm:$0xff]  }
 0x2bf   :  { %627 = vmatpush1.bf16.msra.mxu0 %v2821_v39  ;;  %v2866_v39 = vld [vmem:[#allocation5 + $0x60] ss:$8 sps:$4 sm:$0xff]  }
 0x2c0   :  { %628 = vmatprep.subr.bf16.mxu0 %v2826_v40  ;;  %v2874_v40 = vld [vmem:[#allocation5 + $0x74] ss:$8 sps:$4 sm:$0xff]  }
 0x2c3   :  { %629 = vmatpush1.bf16.msra.mxu0 %v2824_v41  ;;  %v2872_v41 = vld [vmem:[#allocation5 + $0x70] ss:$8 sps:$4 sm:$0xff]  }
 0x2c4   :  { %630 = vmatprep.subr.bf16.mxu0 %v2829_v43  ;;  %v2878_v43 = vld [vmem:[#allocation5 + $0x80] ss:$8 sps:$4 sm:$0xff]  }
 0x2c7   :  { %631 = vmatpush1.bf16.msra.mxu0 %v2827_v42  ;;  %v2880_v42 = vld [vmem:[#allocation5 + $0x84] ss:$8 sps:$4 sm:$0xff]  }
 0x2c8   :  { %1843 = vmatprep.subr.bf16.mxu0 %v2832_v44  ;;  %v2886_v44 = vld [vmem:[#allocation5 + $0x94] ss:$8 sps:$4 sm:$0xff]  }
 0x35d   :  { %v2709_v10 = vpop.f32.mrb[0].mxu0 }
 0x35e   :  { %v376_v11 = vadd.f32 %v2709_v10, %v2390_v9  ;;  %v367_v12 = vpop.f32.mrb[1].mxu0 }
 0x35f   :  { %v368_v13 = vadd.f32 %v2390_v9, %v367_v12  ;;  %v2710_v14 = vpop.f32.mrb[2].mxu0 }
 0x360   :  { %v370_v15 = vpop.f32.mrb[3].mxu0  ;;  %v383_v16 = vmax.f32 %v376_v11, 0.0 }
 0x361   :  { %v381_v17 = vmax.f32 %v368_v13, 0.0  ;;  %v371_v18 = vadd.f32 %v2390_v9, %v370_v15 }
 0x362   :  { %v390_v20 = vrot.slane %v383_v16, 6 }
 0x363   :  { %v382_v19 = vmax.f32 %v371_v18, 0.0  ;;  %v387_v21 = vrot.slane %v381_v17, 6 }
 0x365   :  { %v388_v22 = vrot.slane %v382_v19, 6  ;;  %v426_v23 = vpack.c.bf16 %v382_v19, %v381_v17  ;;  %v2926_v19 = vld [vmem:[#allocation5 + $0x100] ss:$8 sps:$4 sm:$0xff]  }
 0x367   :  { %v389_v24 = vsel %vm134_vm0, %v387_v21, %v388_v22  ;;  %v391_v25 = vsel %vm134_vm0, %v388_v22, %v390_v20 }
 0x368   :  { %v427_v26 = vpack.c.bf16 %v391_v25, %v389_v24  ;;  %v2934_v24 = vld [vmem:[#allocation5 + $0x114] ss:$8 sps:$4 sm:$0xff]  }
 0x36a   :  { %632 = vmatprep.mubr.bf16.mxu0 %v427_v26 }
 0x36b   :  { %633 = vmatmul.mubr.bf16.vlgmr.msra.gmra.mrb[4].mxu0 %v426_v23 }
 0x36c   :  { %1844 = vmatpush1.bf16.msra.mxu0 %v2830_v27  ;;  %v2929_v27 = vld [vmem:[#allocation5 + $0x300] ss:$8 sps:$4 sm:$0xff]  }
 0x36d   :  { %1845 = vmatprep.subr.bf16.mxu0 %v2838_v28 }
 0x370   :  { %1846 = vmatpush1.bf16.msra.mxu0 %v2836_v29  ;;  %v2932_v29 = vld [vmem:[#allocation5 + $0x110] ss:$8 sps:$4 sm:$0xff]  }
 0x371   :  { %1847 = vmatprep.subr.bf16.mxu0 %v2844_v30  ;;  %v2937_v30 = vld [vmem:[#allocation5 + $0x314] ss:$8 sps:$4 sm:$0xff]  }
 0x374   :  { %1848 = vmatpush1.bf16.msra.mxu0 %v2842_v31 }
 0x375   :  { %1849 = vmatprep.subr.bf16.mxu0 %v2850_v32  ;;  %v2940_v32 = vld [vmem:[#allocation5 + $0x124] ss:$8 sps:$4 sm:$0xff]  }
 0x378   :  { %1850 = vmatpush1.bf16.msra.mxu0 %v2848_v33  ;;  %v2935_v33 = vld [vmem:[#allocation5 + $0x310] ss:$8 sps:$4 sm:$0xff]  }
 0x379   :  { %1851 = vmatprep.subr.bf16.mxu0 %v2856_v34  ;;  %v2938_v34 = vld [vmem:[#allocation5 + $0x120] ss:$8 sps:$4 sm:$0xff]  }
 0x37c   :  { %1852 = vmatpush1.bf16.msra.mxu0 %v2854_v35  ;;  %v2943_v35 = vld [vmem:[#allocation5 + $0x324] ss:$8 sps:$4 sm:$0xff]  }
 0x37d   :  { %1853 = vmatprep.subr.bf16.mxu0 %v2862_v36  ;;  %v2946_v36 = vld [vmem:[#allocation5 + $0x134] ss:$8 sps:$4 sm:$0xff]  }
 0x380   :  { %1854 = vmatpush1.bf16.msra.mxu0 %v2860_v37  ;;  %v2941_v37 = vld [vmem:[#allocation5 + $0x320] ss:$8 sps:$4 sm:$0xff]  }
 0x381   :  { %1855 = vmatprep.subr.bf16.mxu0 %v2868_v38  ;;  %v2944_v38 = vld [vmem:[#allocation5 + $0x130] ss:$8 sps:$4 sm:$0xff]  }
 0x384   :  { %1856 = vmatpush1.bf16.msra.mxu0 %v2866_v39  ;;  %v2949_v39 = vld [vmem:[#allocation5 + $0x334] ss:$8 sps:$4 sm:$0xff]  }
 0x385   :  { %1857 = vmatprep.subr.bf16.mxu0 %v2874_v40  ;;  %v2952_v40 = vld [vmem:[#allocation5 + $0x144] ss:$8 sps:$4 sm:$0xff]  }
 0x388   :  { %1858 = vmatpush1.bf16.msra.mxu0 %v2872_v41  ;;  %v2947_v41 = vld [vmem:[#allocation5 + $0x330] ss:$8 sps:$4 sm:$0xff]  }
 0x389   :  { %1859 = vmatprep.subr.bf16.mxu0 %v2880_v42  ;;  %v2950_v42 = vld [vmem:[#allocation5 + $0x140] ss:$8 sps:$4 sm:$0xff]  }
 0x38c   :  { %1860 = vmatpush1.bf16.msra.mxu0 %v2878_v43  ;;  %v2955_v43 = vld [vmem:[#allocation5 + $0x344] ss:$8 sps:$4 sm:$0xff]  }
 0x38d   :  { %1861 = vmatprep.subr.bf16.mxu0 %v2886_v44  ;;  %v2958_v44 = vld [vmem:[#allocation5 + $0x154] ss:$8 sps:$4 sm:$0xff]  }
 0x390   :  { %1862 = vmatpush1.bf16.msra.mxu0 %v2884_v45  ;;  %v2953_v45 = vld [vmem:[#allocation5 + $0x340] ss:$8 sps:$4 sm:$0xff]  }
 0x391   :  { %1863 = vmatprep.subr.bf16.mxu0 %v2892_v46  ;;  %v2956_v46 = vld [vmem:[#allocation5 + $0x150] ss:$8 sps:$4 sm:$0xff]  }
 0x394   :  { %1864 = vmatpush1.bf16.msra.mxu0 %v2890_v47  ;;  %v2961_v47 = vld [vmem:[#allocation5 + $0x354] ss:$8 sps:$4 sm:$0xff]  }
 0x395   :  { %1865 = vmatprep.subr.bf16.mxu0 %v2898_v48  ;;  %v2964_v48 = vld [vmem:[#allocation5 + $0x164] ss:$8 sps:$4 sm:$0xff]  }
 0x398   :  { %1866 = vmatpush1.bf16.msra.mxu0 %v2896_v49  ;;  %v2959_v49 = vld [vmem:[#allocation5 + $0x350] ss:$8 sps:$4 sm:$0xff]  }
 0x399   :  { %1867 = vmatprep.subr.bf16.mxu0 %v2904_v50  ;;  %v2962_v50 = vld [vmem:[#allocation5 + $0x160] ss:$8 sps:$4 sm:$0xff]  }
 0x39c   :  { %1868 = vmatpush1.bf16.msra.mxu0 %v2902_v51  ;;  %v2967_v51 = vld [vmem:[#allocation5 + $0x364] ss:$8 sps:$4 sm:$0xff]  }
 0x39d   :  { %1869 = vmatprep.subr.bf16.mxu0 %v2910_v52  ;;  %v2970_v52 = vld [vmem:[#allocation5 + $0x174] ss:$8 sps:$4 sm:$0xff]  }
 0x3a0   :  { %1870 = vmatpush1.bf16.msra.mxu0 %v2908_v53  ;;  %v2965_v53 = vld [vmem:[#allocation5 + $0x360] ss:$8 sps:$4 sm:$0xff]  }
 0x3a1   :  { %1871 = vmatprep.subr.bf16.mxu0 %v2916_v54  ;;  %v2968_v54 = vld [vmem:[#allocation5 + $0x170] ss:$8 sps:$4 sm:$0xff]  }
 0x3a4   :  { %1872 = vmatpush1.bf16.msra.mxu0 %v2914_v55  ;;  %v2973_v55 = vld [vmem:[#allocation5 + $0x374] ss:$8 sps:$4 sm:$0xff]  }
 0x3a5   :  { %1873 = vmatprep.subr.bf16.mxu0 %v2922_v58  ;;  %v2974_v58 = vld [vmem:[#allocation5 + $0x180] ss:$8 sps:$4 sm:$0xff]  }
 0x3a8   :  { %1874 = vmatpush1.bf16.msra.mxu0 %v2920_v59  ;;  %v2979_v59 = vld [vmem:[#allocation5 + $0x384] ss:$8 sps:$4 sm:$0xff]  }
 0x3a9   :  { %1884 = vmatprep.subr.bf16.mxu0 %v2928_v62  ;;  %v2980_v62 = vld [vmem:[#allocation5 + $0x190] ss:$8 sps:$4 sm:$0xff]  }
 0x43e   :  { %v634_v7 = vpop.f32.mrb[4].mxu0 }
 0x43f   :  { %v635_v8 = vadd.f32 %v634_v7, %v433_v5  ;;  %v636_v9 = vpop.f32.mrb[5].mxu0  ;;  %v2994_v7 = vld [vmem:[#allocation5 + $0x1b4] ss:$8 sps:$4 sm:$0xff]  }
 0x440   :  { %v637_v10 = vadd.f32 %v636_v9, %v437_v6  ;;  %v638_v11 = vpop.f32.mrb[6].mxu0  ;;  %v2992_v9 = vld [vmem:[#allocation5 + $0x1b0] ss:$8 sps:$4 sm:$0xff]  }
 0x441   :  { %v3474_v12 = vmax.f32 %v635_v8, 0.0  ;;  %v3476_v13 = vadd.f32 %v638_v11, %v433_v5  ;;  %v640_v14 = vpop.f32.mrb[7].mxu0  ;;  %v2986_v5 = vld [vmem:[#allocation5 + $0x1a0] ss:$8 sps:$4 sm:$0xff]   ;;  %v3000_v11 = vld [vmem:[#allocation5 + $0x1c4] ss:$8 sps:$4 sm:$0xff]  }
 0x442   :  { %v644_v15 = vmax.f32 %v637_v10, 0.0  ;;  %v641_v16 = vadd.f32 %v640_v14, %v437_v6  ;;  %v2991_v6 = vld [vmem:[#allocation5 + $0x3a4] ss:$8 sps:$4 sm:$0xff]   ;;  %v2989_v8 = vld [vmem:[#allocation5 + $0x3a0] ss:$8 sps:$4 sm:$0xff]  }
 0x443   :  { %v653_v17 = vrot.slane %v3474_v12, 6  ;;  %v859_v22 = vpack.c.bf16 %v3474_v12, %v3474_v12  ;;  %v2997_v10 = vld [vmem:[#allocation5 + $0x3b4] ss:$8 sps:$4 sm:$0xff]   ;;  %v2995_v14 = vld [vmem:[#allocation5 + $0x3b0] ss:$8 sps:$4 sm:$0xff]  }
 0x444   :  { %v860_v18 = vpack.c.bf16 %v644_v15, %v644_v15  ;;  %v650_v20 = vrot.slane %v644_v15, 2  ;;  %v654_v21 = vrot.slane %v644_v15, 6  ;;  %v3481_v23 = vmax.f32 %v641_v16, 0.0  ;;  %v2998_v15 = vld [vmem:[#allocation5 + $0x1c0] ss:$8 sps:$4 sm:$0xff]  }
 0x445   :  { %v863_v28 = vpack.c.bf16 %v653_v17, %v653_v17  ;;  %v3003_v16 = vld [vmem:[#allocation5 + $0x3c4] ss:$8 sps:$4 sm:$0xff]   ;;  %v3006_v17 = vld [vmem:[#allocation5 + $0x1d4] ss:$8 sps:$4 sm:$0xff]  }
 0x446   :  { %1875 = vmatprep.mubr.bf16.mxu0 %v860_v18  ;;  %v862_v25 = vpack.c.bf16 %v650_v20, %v650_v20  ;;  %v864_v26 = vpack.c.bf16 %v654_v21, %v654_v21  ;;  %v866_v31 = vpack.c.bf16 %v3481_v23, %v3481_v23  ;;  %v3001_v18 = vld [vmem:[#allocation5 + $0x3c0] ss:$8 sps:$4 sm:$0xff]   ;;  %v3009_v20 = vld [vmem:[#allocation5 + $0x3d4] ss:$8 sps:$4 sm:$0xff]   ;;  %v3012_v21 = vld [vmem:[#allocation5 + $0x1e4] ss:$8 sps:$4 sm:$0xff]  }
 0x447   :  { %1876 = vmatmul.mubr.bf16.vlgmr.msra.gmra.mrb[8].mxu0 %v859_v22  ;;  %v3007_v22 = vld [vmem:[#allocation5 + $0x3d0] ss:$8 sps:$4 sm:$0xff]  }
 0x448   :  { %1885 = vmatpush1.bf16.msra.mxu0 %v2926_v19  ;;  %1916 = vmatprep.mubr.bf16.mxu0 %v862_v25  ;;  %v3004_v19 = vld [vmem:[#allocation5 + $0x1d0] ss:$8 sps:$4 sm:$0xff]   ;;  %v3015_v25 = vld [vmem:[#allocation5 + $0x3e4] ss:$8 sps:$4 sm:$0xff]  }
 0x449   :  { %1957 = vmatprep.mubr.bf16.mxu1 %v864_v26  ;;  %1886 = vmatprep.subr.bf16.mxu0 %v2934_v24  ;;  %v3010_v24 = vld [vmem:[#allocation5 + $0x1e0] ss:$8 sps:$4 sm:$0xff]   ;;  %v3018_v26 = vld [vmem:[#allocation5 + $0x1f4] ss:$8 sps:$4 sm:$0xff]  }
 0x44a   :  { %1958 = vmatmul.mubr.bf16.vlgmr.msra.gmra.mrb[4].mxu1 %v863_v28  ;;  %v3016_v28 = vld [vmem:[#allocation5 + $0x1f0] ss:$8 sps:$4 sm:$0xff]  }
 0x44b   :  { %1967 = vmatpush1.bf16.msra.mxu1 %v2929_v27  ;;  %1998 = vmatprep.mubr.bf16.mxu1 %v866_v31  ;;  %v3013_v27 = vld [vmem:[#allocation5 + $0x3e0] ss:$8 sps:$4 sm:$0xff]   ;;  %v3019_v31 = vld [vmem:[#allocation5 + $0x3f0] ss:$8 sps:$4 sm:$0xff]  }
 0x44c   :  { %1887 = vmatpush1.bf16.msra.mxu0 %v2932_v29  ;;  %1968 = vmatprep.subr.bf16.mxu1 %v2937_v30  ;;  %v3021_v29 = vld [vmem:[#allocation5 + $0x3f4] ss:$8 sps:$4 sm:$0xff]   ;;  %v649_v30 = vrot.slane %v3474_v12, 2 }
 0x44d   :  { %1888 = vmatprep.subr.bf16.mxu0 %v2940_v32  ;;  %v3487_v32 = vmax.f32 %v3476_v13, 0.0  ;;  %v3027_v12 = vld [vmem:[#allocation5 + $0x414] ss:$8 sps:$4 sm:$0xff]   ;;  %v3025_v13 = vld [vmem:[#allocation5 + $0x410] ss:$8 sps:$4 sm:$0xff]  }
 0x44f   :  { %1969 = vmatpush1.bf16.msra.mxu1 %v2935_v33  ;;  %v3024_v33 = vld [vmem:[#allocation5 + $0x404] ss:$8 sps:$4 sm:$0xff]  }
 0x450   :  { %1889 = vmatpush1.bf16.msra.mxu0 %v2938_v34  ;;  %1970 = vmatprep.subr.bf16.mxu1 %v2943_v35  ;;  %v861_v34 = vpack.c.bf16 %v649_v30, %v649_v30  ;;  %v660_v35 = vrot.slane %v3481_v23, 4  ;;  %v3121_v30 = vld [vmem:[%s3595_s11 + $0x8] sm:$0xff]  }
 0x451   :  { %1890 = vmatprep.subr.bf16.mxu0 %v2946_v36  ;;  %v3022_v36 = vld [vmem:[#allocation5 + $0x400] ss:$8 sps:$4 sm:$0xff]  }
 0x453   :  { %1971 = vmatpush1.bf16.msra.mxu1 %v2941_v37  ;;  %v865_v37 = vpack.c.bf16 %v3487_v32, %v3487_v32 }
 0x454   :  { %1891 = vmatpush1.bf16.msra.mxu0 %v2944_v38  ;;  %1972 = vmatprep.subr.bf16.mxu1 %v2949_v39  ;;  %v868_v38 = vpack.c.bf16 %v660_v35, %v660_v35  ;;  %v3030_v39 = vld [vmem:[#allocation5 + $0x424] ss:$8 sps:$4 sm:$0xff]   ;;  %v3123_v35 = vld [vmem:[%s3595_s11 + $0x10] sm:$0xff]  }
 0x455   :  { %1892 = vmatprep.subr.bf16.mxu0 %v2952_v40  ;;  %v3028_v40 = vld [vmem:[#allocation5 + $0x420] ss:$8 sps:$4 sm:$0xff]  }
 0x457   :  { %1973 = vmatpush1.bf16.msra.mxu1 %v2947_v41  ;;  %v3033_v41 = vld [vmem:[#allocation5 + $0x434] ss:$8 sps:$4 sm:$0xff]  }
 0x458   :  { %1893 = vmatpush1.bf16.msra.mxu0 %v2950_v42  ;;  %1974 = vmatprep.subr.bf16.mxu1 %v2955_v43  ;;  %v3031_v42 = vld [vmem:[#allocation5 + $0x430] ss:$8 sps:$4 sm:$0xff]   ;;  %v3036_v43 = vld [vmem:[#allocation5 + $0x444] ss:$8 sps:$4 sm:$0xff]  }
 0x459   :  { %1894 = vmatprep.subr.bf16.mxu0 %v2958_v44  ;;  %v3034_v44 = vld [vmem:[#allocation5 + $0x440] ss:$8 sps:$4 sm:$0xff]  }
 0x45b   :  { %1975 = vmatpush1.bf16.msra.mxu1 %v2953_v45  ;;  %v3039_v45 = vld [vmem:[#allocation5 + $0x454] ss:$8 sps:$4 sm:$0xff]  }
 0x45c   :  { %1895 = vmatpush1.bf16.msra.mxu0 %v2956_v46  ;;  %1976 = vmatprep.subr.bf16.mxu1 %v2961_v47  ;;  %v3037_v46 = vld [vmem:[#allocation5 + $0x450] ss:$8 sps:$4 sm:$0xff]   ;;  %v3042_v47 = vld [vmem:[#allocation5 + $0x464] ss:$8 sps:$4 sm:$0xff]  }
 0x45d   :  { %1896 = vmatprep.subr.bf16.mxu0 %v2964_v48  ;;  %v3040_v48 = vld [vmem:[#allocation5 + $0x460] ss:$8 sps:$4 sm:$0xff]  }
 0x45f   :  { %1977 = vmatpush1.bf16.msra.mxu1 %v2959_v49  ;;  %v3045_v49 = vld [vmem:[#allocation5 + $0x474] ss:$8 sps:$4 sm:$0xff]  }
 0x460   :  { %1897 = vmatpush1.bf16.msra.mxu0 %v2962_v50  ;;  %1978 = vmatprep.subr.bf16.mxu1 %v2967_v51  ;;  %v3043_v50 = vld [vmem:[#allocation5 + $0x470] ss:$8 sps:$4 sm:$0xff]   ;;  %v3048_v51 = vld [vmem:[#allocation5 + $0x484] ss:$8 sps:$4 sm:$0xff]  }
 0x461   :  { %1898 = vmatprep.subr.bf16.mxu0 %v2970_v52  ;;  %v3046_v52 = vld [vmem:[#allocation5 + $0x480] ss:$8 sps:$4 sm:$0xff]  }
 0x463   :  { %1979 = vmatpush1.bf16.msra.mxu1 %v2965_v53  ;;  %v3051_v53 = vld [vmem:[#allocation5 + $0x494] ss:$8 sps:$4 sm:$0xff]  }
 0x464   :  { %1899 = vmatpush1.bf16.msra.mxu0 %v2968_v54  ;;  %1980 = vmatprep.subr.bf16.mxu1 %v2973_v55  ;;  %v3049_v54 = vld [vmem:[#allocation5 + $0x490] ss:$8 sps:$4 sm:$0xff]   ;;  %v3054_v55 = vld [vmem:[#allocation5 + $0x4a4] ss:$8 sps:$4 sm:$0xff]  }
 0x465   :  { %1900 = vmatprep.subr.bf16.mxu0 %v2976_v56  ;;  %v3052_v56 = vld [vmem:[#allocation5 + $0x4a0] ss:$8 sps:$4 sm:$0xff]  }
 0x467   :  { %1981 = vmatpush1.bf16.msra.mxu1 %v2971_v57  ;;  %v3057_v57 = vld [vmem:[#allocation5 + $0x4b4] ss:$8 sps:$4 sm:$0xff]  }
 0x468   :  { %1901 = vmatpush1.bf16.msra.mxu0 %v2974_v58  ;;  %1982 = vmatprep.subr.bf16.mxu1 %v2979_v59  ;;  %v3055_v58 = vld [vmem:[#allocation5 + $0x4b0] ss:$8 sps:$4 sm:$0xff]   ;;  %v3060_v59 = vld [vmem:[#allocation5 + $0x4c4] ss:$8 sps:$4 sm:$0xff]  }
 0x469   :  { %1902 = vmatprep.subr.bf16.mxu0 %v2982_v60  ;;  %v3058_v60 = vld [vmem:[#allocation5 + $0x4c0] ss:$8 sps:$4 sm:$0xff]  }
 0x46b   :  { %1983 = vmatpush1.bf16.msra.mxu1 %v2977_v61  ;;  %v3063_v61 = vld [vmem:[#allocation5 + $0x4d4] ss:$8 sps:$4 sm:$0xff]  }
 0x46c   :  { %1903 = vmatpush1.bf16.msra.mxu0 %v2980_v62  ;;  %1984 = vmatprep.subr.bf16.mxu1 %v2985_v63  ;;  %v3061_v62 = vld [vmem:[#allocation5 + $0x4d0] ss:$8 sps:$4 sm:$0xff]   ;;  %v3066_v63 = vld [vmem:[#allocation5 + $0x4e4] ss:$8 sps:$4 sm:$0xff]  }
 0x46d   :  { %1904 = vmatprep.subr.bf16.mxu0 %v2988_v0  ;;  %v3064_v0 = vld [vmem:[#allocation5 + $0x4e0] ss:$8 sps:$4 sm:$0xff]  }
 0x46f   :  { %1985 = vmatpush1.bf16.msra.mxu1 %v2983_v3  ;;  %v3069_v3 = vld [vmem:[#allocation5 + $0x4f4] ss:$8 sps:$4 sm:$0xff]  }
 0x470   :  { %1905 = vmatpush1.bf16.msra.mxu0 %v2986_v5  ;;  %1986 = vmatprep.subr.bf16.mxu1 %v2991_v6  ;;  %v3067_v5 = vld [vmem:[#allocation5 + $0x4f0] ss:$8 sps:$4 sm:$0xff]   ;;  %v659_v6 = vrot.slane %v3487_v32, 4 }
 0x471   :  { %1906 = vmatprep.subr.bf16.mxu0 %v2994_v7  ;;  %v3072_v7 = vld [vmem:[#allocation5 + $0x504] ss:$8 sps:$4 sm:$0xff]  }
 0x473   :  { %1987 = vmatpush1.bf16.msra.mxu1 %v2989_v8  ;;  %v664_v8 = vrot.slane %v3481_v23, 6  ;;  %v3084_v23 = vld [vmem:[#allocation5 + $0x544] ss:$8 sps:$4 sm:$0xff]  }
 0x474   :  { %1907 = vmatpush1.bf16.msra.mxu0 %v2992_v9  ;;  %1988 = vmatprep.subr.bf16.mxu1 %v2997_v10  ;;  %v3070_v9 = vld [vmem:[#allocation5 + $0x500] ss:$8 sps:$4 sm:$0xff]   ;;  %v867_v10 = vpack.c.bf16 %v659_v6, %v659_v6 }
 0x475   :  { %1908 = vmatprep.subr.bf16.mxu0 %v3000_v11  ;;  %v3075_v11 = vld [vmem:[#allocation5 + $0x514] ss:$8 sps:$4 sm:$0xff]  }
 0x477   :  { %1989 = vmatpush1.bf16.msra.mxu1 %v2995_v14  ;;  %v870_v14 = vpack.c.bf16 %v664_v8, %v664_v8 }
 0x478   :  { %1909 = vmatpush1.bf16.msra.mxu0 %v2998_v15  ;;  %1990 = vmatprep.subr.bf16.mxu1 %v3003_v16  ;;  %v3073_v15 = vld [vmem:[#allocation5 + $0x510] ss:$8 sps:$4 sm:$0xff]   ;;  %v3078_v16 = vld [vmem:[#allocation5 + $0x524] ss:$8 sps:$4 sm:$0xff]  }
 0x479   :  { %1910 = vmatprep.subr.bf16.mxu0 %v3006_v17  ;;  %v3076_v17 = vld [vmem:[#allocation5 + $0x520] ss:$8 sps:$4 sm:$0xff]  }
 0x47b   :  { %1991 = vmatpush1.bf16.msra.mxu1 %v3001_v18  ;;  %v3081_v18 = vld [vmem:[#allocation5 + $0x534] ss:$8 sps:$4 sm:$0xff]  }
 0x47c   :  { %1911 = vmatpush1.bf16.msra.mxu0 %v3004_v19  ;;  %1992 = vmatprep.subr.bf16.mxu1 %v3009_v20  ;;  %v3079_v19 = vld [vmem:[#allocation5 + $0x530] ss:$8 sps:$4 sm:$0xff]   ;;  %v3082_v20 = vld [vmem:[#allocation5 + $0x540] ss:$8 sps:$4 sm:$0xff]  }
 0x47d   :  { %1912 = vmatprep.subr.bf16.mxu0 %v3012_v21  ;;  %v3087_v21 = vld [vmem:[#allocation5 + $0x554] ss:$8 sps:$4 sm:$0xff]  }
 0x47f   :  { %1993 = vmatpush1.bf16.msra.mxu1 %v3007_v22  ;;  %v3085_v22 = vld [vmem:[#allocation5 + $0x550] ss:$8 sps:$4 sm:$0xff]  }
 0x480   :  { %1913 = vmatpush1.bf16.msra.mxu0 %v3010_v24  ;;  %1994 = vmatprep.subr.bf16.mxu1 %v3015_v25  ;;  %v3090_v24 = vld [vmem:[#allocation5 + $0x564] ss:$8 sps:$4 sm:$0xff]  }
 0x481   :  { %1914 = vmatprep.subr.bf16.mxu0 %v3018_v26  ;;  %v3118_v25 = vld [vmem:[%s3595_s11 + $0x40] sm:$0xff]  }
 0x482   :  { %v3119_v26 = vld [vmem:[%s3595_s11] sm:$0xff]  }
 0x483   :  { %1995 = vmatpush1.bf16.msra.mxu1 %v3013_v27  ;;  %v3120_v27 = vld [vmem:[%s3595_s11 + $0x48] sm:$0xff]  }
 0x484   :  { %1915 = vmatpush1.bf16.msra.mxu0 %v3016_v28  ;;  %1996 = vmatprep.subr.bf16.mxu1 %v3021_v29  ;;  %v3088_v28 = vld [vmem:[#allocation5 + $0x560] ss:$8 sps:$4 sm:$0xff]   ;;  %v3093_v29 = vld [vmem:[#allocation5 + $0x574] ss:$8 sps:$4 sm:$0xff]  }
 0x485   :  { %2656 = vmatprep.subr.bf16.mxu0 %v3118_v25 }
 0x487   :  { %1997 = vmatpush1.bf16.msra.mxu1 %v3019_v31  ;;  %1917 = vmatmul.mubr.bf16.vlgmr.msra.gmra.mrb[8].mxu0 %v861_v34  ;;  %v3122_v31 = vld [vmem:[%s3595_s11 + $0x50] sm:$0xff]   ;;  %v3096_v34 = vld [vmem:[#allocation5 + $0x584] ss:$8 sps:$4 sm:$0xff]  }
 0x488   :  { %2007 = vmatprep.subr.bf16.mxu1 %v3024_v33  ;;  %2657 = vmatpush3.bf16.msra.mxu0 %v3119_v26  ;;  %v3091_v33 = vld [vmem:[#allocation5 + $0x570] ss:$8 sps:$4 sm:$0xff]   ;;  %v2623_v26 = vld [vmem:[%s3596_s12] ss:$0 sm:$0xff]  ;;  %s3221_s12 = smov [#allocation7]  }
 0x489   :  { %2658 = vmatprep.subr.bf16.mxu0 %v3120_v27 }
 0x48a   :  { %1999 = vmatmul.mubr.bf16.vlgmr.msra.gmra.mrb[4].mxu1 %v865_v37  ;;  %v3094_v37 = vld [vmem:[#allocation5 + $0x580] ss:$8 sps:$4 sm:$0xff]  }
 0x48b   :  { %2008 = vmatpush1.bf16.msra.mxu1 %v3022_v36  ;;  %2039 = vmatprep.mubr.bf16.mxu1 %v868_v38  ;;  %v3124_v36 = vld [vmem:[%s3595_s11 + $0x58] sm:$0xff]  }
 0x48c   :  { %2009 = vmatprep.subr.bf16.mxu1 %v3027_v12  ;;  %2659 = vmatpush3.bf16.msra.mxu0 %v3121_v30  ;;  %v3099_v12 = vld [vmem:[#allocation5 + $0x594] ss:$8 sps:$4 sm:$0xff]  }
 0x48d   :  { %2660 = vmatprep.subr.bf16.mxu0 %v3122_v31  ;;  %v3125_v38 = vld [vmem:[%s3595_s11 + $0x18] sm:$0xff]  }
 0x48f   :  { %2010 = vmatpush1.bf16.msra.mxu1 %v3025_v13  ;;  %v3126_v13 = vld [vmem:[%s3595_s11 + $0x60] sm:$0xff]  }
 0x490   :  { %2011 = vmatprep.subr.bf16.mxu1 %v3030_v39  ;;  %2661 = vmatpush3.bf16.msra.mxu0 %v3123_v35  ;;  %v3097_v39 = vld [vmem:[#allocation5 + $0x590] ss:$8 sps:$4 sm:$0xff]  }
 0x491   :  { %2662 = vmatprep.subr.bf16.mxu0 %v3124_v36 }
 0x493   :  { %2012 = vmatpush1.bf16.msra.mxu1 %v3028_v40  ;;  %v3102_v40 = vld [vmem:[#allocation5 + $0x5a4] ss:$8 sps:$4 sm:$0xff]  }
 0x494   :  { %2013 = vmatprep.subr.bf16.mxu1 %v3033_v41  ;;  %2663 = vmatpush3.bf16.msra.mxu0 %v3125_v38  ;;  %v3127_v41 = vld [vmem:[%s3595_s11 + $0x20] sm:$0xff]  }
 0x495   :  { %2664 = vmatprep.subr.bf16.mxu0 %v3126_v13 }
 0x497   :  { %2014 = vmatpush1.bf16.msra.mxu1 %v3031_v42  ;;  %v3128_v42 = vld [vmem:[%s3595_s11 + $0x68] sm:$0xff]  }
 0x498   :  { %2015 = vmatprep.subr.bf16.mxu1 %v3036_v43  ;;  %v3100_v43 = vld [vmem:[#allocation5 + $0x5a0] ss:$8 sps:$4 sm:$0xff]   ;;  %2665 = vmatpush3.bf16.msra.mxu0 %v3127_v41 }
 0x499   :  { %2666 = vmatprep.subr.bf16.mxu0 %v3128_v42 }
 0x49b   :  { %2016 = vmatpush1.bf16.msra.mxu1 %v3034_v44  ;;  %v3105_v44 = vld [vmem:[#allocation5 + $0x5b4] ss:$8 sps:$4 sm:$0xff]  }
 0x49c   :  { %2017 = vmatprep.subr.bf16.mxu1 %v3039_v45  ;;  %v3129_v45 = vld [vmem:[%s3595_s11 + $0x28] sm:$0xff]  }
 0x49d   :  { %2667 = vmatpush3.bf16.msra.mxu0 %v3129_v45 }
 0x49f   :  { %2018 = vmatpush1.bf16.msra.mxu1 %v3037_v46  ;;  %v3103_v46 = vld [vmem:[#allocation5 + $0x5b0] ss:$8 sps:$4 sm:$0xff]  }
 0x4a0   :  { %2019 = vmatprep.subr.bf16.mxu1 %v3042_v47  ;;  %v3108_v47 = vld [vmem:[#allocation5 + $0x5c4] ss:$8 sps:$4 sm:$0xff]  }
 0x4a3   :  { %2020 = vmatpush1.bf16.msra.mxu1 %v3040_v48  ;;  %v3106_v48 = vld [vmem:[#allocation5 + $0x5c0] ss:$8 sps:$4 sm:$0xff]  }
 0x4a4   :  { %2021 = vmatprep.subr.bf16.mxu1 %v3045_v49  ;;  %v3111_v49 = vld [vmem:[#allocation5 + $0x5d4] ss:$8 sps:$4 sm:$0xff]  }
 0x4a7   :  { %2022 = vmatpush1.bf16.msra.mxu1 %v3043_v50  ;;  %v3109_v50 = vld [vmem:[#allocation5 + $0x5d0] ss:$8 sps:$4 sm:$0xff]  }
 0x4a8   :  { %2023 = vmatprep.subr.bf16.mxu1 %v3048_v51  ;;  %v3114_v51 = vld [vmem:[#allocation5 + $0x5e4] ss:$8 sps:$4 sm:$0xff]  }
 0x4ab   :  { %2024 = vmatpush1.bf16.msra.mxu1 %v3046_v52  ;;  %v3112_v52 = vld [vmem:[#allocation5 + $0x5e0] ss:$8 sps:$4 sm:$0xff]  }
 0x4ac   :  { %2025 = vmatprep.subr.bf16.mxu1 %v3051_v53  ;;  %v3117_v53 = vld [vmem:[#allocation5 + $0x5f4] ss:$8 sps:$4 sm:$0xff]  }
 0x4af   :  { %2026 = vmatpush1.bf16.msra.mxu1 %v3049_v54  ;;  %v3115_v54 = vld [vmem:[#allocation5 + $0x5f0] ss:$8 sps:$4 sm:$0xff]  }
 0x4b0   :  { %2027 = vmatprep.subr.bf16.mxu1 %v3054_v55  ;;  %v663_v55 = vrot.slane %v3487_v32, 6  ;;  %v3132_v32 = vld [vmem:[%s3595_s11 + $0x78] sm:$0xff]  }
 0x4b3   :  { %2028 = vmatpush1.bf16.msra.mxu1 %v3052_v56  ;;  %v869_v56 = vpack.c.bf16 %v663_v55, %v663_v55 }
 0x4b4   :  { %2029 = vmatprep.subr.bf16.mxu1 %v3057_v57 }
 0x4b7   :  { %2030 = vmatpush1.bf16.msra.mxu1 %v3055_v58 }
 0x4b8   :  { %2031 = vmatprep.subr.bf16.mxu1 %v3060_v59 }
 0x4bb   :  { %2032 = vmatpush1.bf16.msra.mxu1 %v3058_v60  ;;  %v3130_v60 = vld [vmem:[%s3595_s11 + $0x70] sm:$0xff]  }
 0x4bc   :  { %2033 = vmatprep.subr.bf16.mxu1 %v3063_v61  ;;  %2668 = vmatprep.subr.bf16.mxu0 %v3130_v60 }
 0x4bf   :  { %2034 = vmatpush1.bf16.msra.mxu1 %v3061_v62  ;;  %v3131_v62 = vld [vmem:[%s3595_s11 + $0x30] sm:$0xff]  }
 0x4c0   :  { %2035 = vmatprep.subr.bf16.mxu1 %v3066_v63  ;;  %2669 = vmatpush3.bf16.msra.mxu0 %v3131_v62  ;;  %v3133_v63 = vld [vmem:[%s3595_s11 + $0x38] sm:$0xff]  }
 0x4c1   :  { %2670 = vmatprep.subr.bf16.mxu0 %v3132_v32 }
 0x4c3   :  { %2036 = vmatpush1.bf16.msra.mxu1 %v3064_v0  ;;  %v3218_v0 = vmov 0.0|0.0  }
 0x4c4   :  { %2037 = vmatprep.subr.bf16.mxu1 %v3069_v3  ;;  %2671 = vmatpush3.bf16.msra.mxu0 %v3133_v63  ;;  %v871_v3 = vld [vmem:[%s3594_s10] sm:$0x3] }
 0x4c5   :  { %2722 = vmatprep.subr.bf16.mxu0 %v3218_v0  ;;  %v880_v6 = vrot.slane %v871_v3, %v436_v4 }
 0x4c7   :  { %2038 = vmatpush1.bf16.msra.mxu1 %v3067_v5  ;;  %v876_v5 = vrot.slane %v871_v3, %v432_v2  ;;  %v2269_v2 = vld [vmem:[%s3597_s13] sm:$0xff] }
 0x4c8   :  { %2048 = vmatprep.subr.bf16.mxu1 %v3072_v7  ;;  %v2723_v4 = vpack.c.bf16 %v2270_v1, %v2269_v2 }
 0x4ca   :  { %2040 = vmatmul.mubr.bf16.vlgmr.msra.gmra.mrb[4].mxu1 %v867_v10 }
 0x4cb   :  { %2049 = vmatpush1.bf16.msra.mxu1 %v3070_v9  ;;  %2080 = vmatprep.mubr.bf16.mxu1 %v870_v14 }
 0x4cc   :  { %2050 = vmatprep.subr.bf16.mxu1 %v3075_v11 }
 0x4cf   :  { %2051 = vmatpush1.bf16.msra.mxu1 %v3073_v15 }
 0x4d0   :  { %2052 = vmatprep.subr.bf16.mxu1 %v3078_v16 }
 0x4d3   :  { %2053 = vmatpush1.bf16.msra.mxu1 %v3076_v17 }
 0x4d4   :  { %2054 = vmatprep.subr.bf16.mxu1 %v3081_v18 }
 0x4d7   :  { %2055 = vmatpush1.bf16.msra.mxu1 %v3079_v19 }
 0x4d8   :  { %2056 = vmatprep.subr.bf16.mxu1 %v3084_v23 }
 0x4db   :  { %2057 = vmatpush1.bf16.msra.mxu1 %v3082_v20  ;;  %v2271_v20 = vld [vmem:[%s3597_s13 + $0x10] sm:$0xff] }
 0x4dc   :  { %2058 = vmatprep.subr.bf16.mxu1 %v3087_v21  ;;  %v2272_v21 = vld [vmem:[%s3597_s13 + $0x18] sm:$0xff] }
 0x4df   :  { %2059 = vmatpush1.bf16.msra.mxu1 %v3085_v22  ;;  %v2726_v22 = vpack.c.bf16 %v2272_v21, %v2271_v20 }
 0x4e0   :  { %2060 = vmatprep.subr.bf16.mxu1 %v3090_v24  ;;  %v3220_v24 = vmov 0.0  }
 0x4e3   :  { %2061 = vmatpush1.bf16.msra.mxu1 %v3088_v28 }
 0x4e4   :  { %2062 = vmatprep.subr.bf16.mxu1 %v3093_v29 }
 0x4e7   :  { %2063 = vmatpush1.bf16.msra.mxu1 %v3091_v33 }
 0x4e8   :  { %2064 = vmatprep.subr.bf16.mxu1 %v3096_v34  ;;  %v2640_v34 = vld [vmem:[%s3598_s14] ss:$0 sm:$0xff]  ;;  %s2373_s14 = sshll.u32 %s3221_s12, 4  ;;  %s2374_s14 = int_to_ptr.vmem [resolvable:$true] %s2373_s14 }
 0x4e9   :  { %s3182_s0 = scalar_lea.vmem %s2374_s14, 32  ;;  %p3187_p3 = scmp.lt.s32.totalorder %s2374_s14, %s2374_s14 }
 0x4ea   :  { %p3183_p2 = scmp.ne.s32.totalorder %s2374_s14, %s3182_s0  ;;  %p3188_p4 = scmp.lt.s32.totalorder %s3182_s0, %s3182_s0 }
 0x4eb   :  { %2065 = vmatpush1.bf16.msra.mxu1 %v3094_v37 }
 0x4ec   :  { %2066 = vmatprep.subr.bf16.mxu1 %v3099_v12  ;;  %p3189_p5 = por %p3188_p4, %p3187_p3 }
 0x4ee   :  { %p3190_p6 = pnand %p3189_p5, %p3183_p2 }
 0x4ef   :  { %2067 = vmatpush1.bf16.msra.mxu1 %v3097_v39 }
 0x4f0   :  { %2068 = vmatprep.subr.bf16.mxu1 %v3102_v40 }
 0x4f3   :  { %2069 = vmatpush1.bf16.msra.mxu1 %v3100_v43 }
 0x4f4   :  { %2070 = vmatprep.subr.bf16.mxu1 %v3105_v44 }
 0x4f7   :  { %2071 = vmatpush1.bf16.msra.mxu1 %v3103_v46 }
 0x4f8   :  { %2072 = vmatprep.subr.bf16.mxu1 %v3108_v47 }
 0x4fb   :  { %2073 = vmatpush1.bf16.msra.mxu1 %v3106_v48 }
 0x4fc   :  { %2074 = vmatprep.subr.bf16.mxu1 %v3111_v49 }
 0x4ff   :  { %2075 = vmatpush1.bf16.msra.mxu1 %v3109_v50 }
 0x500   :  { %2076 = vmatprep.subr.bf16.mxu1 %v3114_v51 }
 0x503   :  { %2077 = vmatpush1.bf16.msra.mxu1 %v3112_v52 }
 0x504   :  { %2078 = vmatprep.subr.bf16.mxu1 %v3117_v53 }
 0x507   :  { %2079 = vmatpush1.bf16.msra.mxu1 %v3115_v54 }
 0x50a   :  { %2081 = vmatmul.mubr.bf16.vlgmr.msra.gmra.mrb[4].mxu1 %v869_v56 }
 0x55a   :  { %v1918_v57 = vpop.f32.mrb[8].mxu0 }
 0x55b   :  { %v1920_v58 = vpop.f32.mrb[9].mxu0  ;;  %v2728_v7 = vadd.f32 %v1918_v57, %v876_v5 }
 0x55c   :  { %v1922_v59 = vpop.f32.mrb[10].mxu0  ;;  %v2730_v8 = vadd.f32 %v1920_v58, %v880_v6 }
 0x55d   :  { %v1923_v61 = vpop.f32.mrb[11].mxu0 }
 0x5dd   :  { %v2082_v9 = vpop.f32.mrb[4].mxu1 }
 0x5de   :  { %v2729_v10 = vadd.f32 %v2728_v7, %v2082_v9  ;;  %v2084_v11 = vpop.f32.mrb[5].mxu1 }
 0x5df   :  { %v2731_v14 = vadd.f32 %v2730_v8, %v2084_v11  ;;  %v2086_v15 = vpop.f32.mrb[6].mxu1 }
 0x5e0   :  { %v2089_v16 = vmax.f32 %v2729_v10, 0.0  ;;  %v2087_v17 = vpop.f32.mrb[7].mxu1 }
 0x5e1   :  { %v2090_v18 = vmax.f32 %v2731_v14, 0.0 }
 0x5e2   :  { %v2123_v23 = vpack.c.bf16 %v2089_v16, %v2089_v16 }
 0x5e3   :  { %v2124_v19 = vpack.c.bf16 %v2090_v18, %v2090_v18 }
 0x5e5   :  { %2260 = vmatprep.mubr.bf16.mxu0 %v2124_v19 }
 0x5e6   :  { %2261 = vmatmul.mubr.bf16.vlgmr.msra.gmra.mrb[12].mxu0 %v2123_v23 }
 0x5e7   :  { %2724 = vmatpush3.bf16.msra.mxu0 %v2723_v4  ;;  %2719 = vmatprep.mubr.msk.f32.mxu0 %vm3219_vm5, %v3220_v24 }
 0x5e8   :  { %2725 = vmatprep.subr.bf16.mxu0 %v3218_v0 }
 0x5eb   :  { %2727 = vmatpush3.bf16.msra.mxu0 %v2726_v22 }
 0x6b9   :  { %v2672_v25 = vpop.f32.mrb[12].mxu0 }
 0x6ba   :  { %v2673_v27 = vpop.f32.mrb[13].mxu0 }
 0x6bb   :  { %v2674_v28 = vadd.f32 %v2673_v27, %v2672_v25  ;;  %v2675_v29 = vpop.f32.mrb[14].mxu0 }
 0x6bc   :  { %v2676_v30 = vpop.f32.mrb[15].mxu0 }
 0x6bd   :  { %v2263_v31 = vadd.f32 %v2674_v28, %v2623_v26 }
 0x6bf   :  { %v2268_v33 = vmax.f32 %v2263_v31, 0.0 }
 0x6c1   :  { %2720 = vmatmul.mubr.msk.f32.vlgmr.msra.gmra.mrb[16].mxu0 %vm180_vm2, %v2268_v33 }
 0x794   :  { %v2349_v35 = vpop.f32.mrb[16].mxu0 }
 0x795   :  { %v2350_v36 = vadd.f32 %v2640_v34, %v2349_v35  ;;  %v2721_v37 = vpop.f32.mrb[17].mxu0 }
 0x797   :  { %v2354_v12 = vsel %vm2353_vm6, %v2350_v36, -inf }
 0x798   :  { %2355 = vmax.xlane.f32.xlu0 %v2354_v12 }
 0x825   :  { %v2356_v38 = vpop.xlane.xlu0 %2355 }
 0x826   :  { %v2357_v13 = vsub.f32 %v2350_v36, %v2356_v38 }
 0x828   :  { %v2358_v39 = vmul.f32 1.442695, %v2357_v13 }
 0x82a   :  { %3134 = vpow2.f32 %v2358_v39 }
 0x834   :  { %v3135_v40 = vpop.eup %3134 }
 0x835   :  { %v2360_v41 = vsel %vm2353_vm6, %v3135_v40, 0.0 }
 0x836   :  { %2361 = vadd.xlane.f32.xlu1 %v2360_v41 }
 0x8c3   :  { %v2362_v42 = vpop.xlane.xlu1 %2361 }
 0x8c4   :  { %3136 = vlog2.f32 %v2362_v42 }
 0x8ce   :  { %v3137_v43 = vpop.eup %3136 }
 0x8cf   :  { %v2364_v44 = vmul.f32 0.6931472, %v3137_v43 }
 0x8d1   :  { %v2365_v45 = vsub.f32 %v2357_v13, %v2364_v44 }
 0x8d3   :  { %2366 = vst.msk [vmem:[#allocation7] sm:$0x3] %vm2353_vm6, %v2365_v45 }
 0x8d4   :  { %3193 = shalt.err (!%p3190_p6)
}
 0x8d5   :  { %s3194_s7 = scalar_lea.hbm %s3599_s15, 32 }
 0x8d6   :  { %p3195_p7 = scmp.ne.s32.totalorder %s3599_s15, %s3194_s7  ;;  %p3198_p8 = scmp.lt.u32.totalorder %s3194_s7, %s3599_s15 }
 0x8d8   :  { %p3200_p9 = pnand %p3198_p8, %p3195_p7 }
 0x8da   :  { %3203 = shalt.err (!%p3200_p9)
}
 0x8db   :  { %2376 = dma.vmem_to_hbm [thread:$0]  %s2374_s14, 32, %s3599_s15, [#allocation4]  }
 0x8dc   :  { %3208 = dma.done.wait [#allocation4], 32  }
 0x8dd   :  { %3209 = vsyncadd [#allocation4], 4294967264 }
 0x8de   :  { %2380 = vsyncpa [#allocation3], 1 }
 0x8df   :  { %2381 = vsyncpa [#allocation6], 1 }
 0x8e0   :  { %2382 = vsyncpa [#allocation4], 1 }

</bundles_post_ra>
